<compile_context>
chip_gen: v7x
topology: tpu7x:2x2x1
jax: 0.10.0
libtpu: 0.0.40
codegen_flags: <defaults>
</compile_context>

<pallas_src>
import math

import jax
import jax.numpy as jnp
from jax.experimental import pallas as pl
from jax.experimental.pallas import tpu as pltpu

EMBED_DIM = 32
NUM_HEADS = 4
HEAD_DIM = EMBED_DIM // NUM_HEADS
LN_EPS = 1e-5  # torch.nn.LayerNorm default


# ---------------------------------------------------------------------------
# Shared elementwise math.
# ---------------------------------------------------------------------------
def _layernorm(h, g, b):
    mu = jnp.mean(h, axis=-1, keepdims=True)
    var = jnp.mean(jnp.square(h - mu), axis=-1, keepdims=True)
    return (h - mu) * jax.lax.rsqrt(var + LN_EPS) * g + b


def _gelu_exact(x):
    # torch.nn.GELU() default is the exact (erf-based) GELU.
    return 0.5 * x * (1.0 + jax.lax.erf(x / math.sqrt(2.0)))


# ---------------------------------------------------------------------------
# In-kernel attention with fused / pre-split per-head weights.
#   q_src : (Bb*Sq, E)   already layernormed query-side tokens
#   kv_src: (Bb*Sk, E)   key/value-side tokens
#   wq/wk/wv : (2H, E, d)   bq/bk/bv : (2H, d)
#   wo       : (2H, d, E)   bo       : (2, E)
#   a: which attention (0 = self, 1 = cross), static Python int.
# ---------------------------------------------------------------------------
def _attn_block(q_src, kv_src, Bb, Sq, Sk, a,
                wq, bq, wk, bk, wv, bv, wo, bo):
    scale = 1.0 / math.sqrt(HEAD_DIM)
    off = a * NUM_HEADS

    # Token-wise per-head projections on the flat slab (leading-dim weight
    # indexing only; no lane slices).
    qs, ks, vs = [], [], []
    for h in range(NUM_HEADS):
        qs.append(jnp.dot(q_src, wq[off + h],
                          preferred_element_type=jnp.float32) + bq[off + h])
        ks.append(jnp.dot(kv_src, wk[off + h],
                          preferred_element_type=jnp.float32) + bk[off + h])
        vs.append(jnp.dot(kv_src, wv[off + h],
                          preferred_element_type=jnp.float32) + bv[off + h])

    rows = []
    for b in range(Bb):  # attention is per batch element (static loop)
        acc = jnp.zeros((Sq, EMBED_DIM), jnp.float32)
        for h in range(NUM_HEADS):
            qh = qs[h][b * Sq:(b + 1) * Sq]   # row (sublane) slices only
            kh = ks[h][b * Sk:(b + 1) * Sk]
            vh = vs[h][b * Sk:(b + 1) * Sk]
            s = jax.lax.dot_general(qh, kh, (((1,), (1,)), ((), ())),
                                    preferred_element_type=jnp.float32) * scale
            s = s - jnp.max(s, axis=-1, keepdims=True)
            p = jnp.exp(s)
            p = p / jnp.sum(p, axis=-1, keepdims=True)
            ctx = jnp.dot(p, vh, preferred_element_type=jnp.float32)  # (Sq, d)
            # Per-head output-projection accumulation (no lane concat).
            acc = acc + jnp.dot(ctx, wo[off + h],
                                preferred_element_type=jnp.float32)
        rows.append(acc)
    o = rows[0] if Bb == 1 else jnp.concatenate(rows, axis=0)  # row concat
    return o + bo[a]


# ---------------------------------------------------------------------------
# Pallas kernel body: one block of Bb batch elements per program.
# ---------------------------------------------------------------------------
def _cross_block_kernel(x_ref, xc_ref, ln_g_ref, ln_b_ref,
                        wq_ref, bq_ref, wk_ref, bk_ref, wv_ref, bv_ref,
                        wo_ref, bo_ref, fc_w_ref, fc_b_ref,
                        proj_w_ref, proj_b_ref, o_ref):
    Bb, S, E = x_ref.shape
    _, Sc, _ = xc_ref.shape

    # Merge leading dims for all token-wise ops (layout-free reshape).
    x = x_ref[...].reshape(Bb * S, E)
    xc = xc_ref[...].reshape(Bb * Sc, E)

    ln_g, ln_b = ln_g_ref[...], ln_b_ref[...]
    wq, bq = wq_ref[...], bq_ref[...]
    wk, bk = wk_ref[...], bk_ref[...]
    wv, bv = wv_ref[...], bv_ref[...]
    wo, bo = wo_ref[...], bo_ref[...]

    # x = ln_1(x); x = x + self_attn(qw(x), kw(x), vw(x))
    h = _layernorm(x, ln_g[0], ln_b[0])
    h = h + _attn_block(h, h, Bb, S, S, 0, wq, bq, wk, bk, wv, bv, wo, bo)

    # x = ln_2(x); x = x + cross_attn(cqw(x), ckw(x_cross), cvw(x_cross))
    h = _layernorm(h, ln_g[1], ln_b[1])
    h = h + _attn_block(h, xc, Bb, S, Sc, 1, wq, bq, wk, bk, wv, bv, wo, bo)

    # x = ln_3(x); x = x + c_proj(gelu(c_fc(x)))   (dropout(p=0) == identity)
    h = _layernorm(h, ln_g[2], ln_b[2])
    m = _gelu_exact(jnp.dot(h, fc_w_ref[...],
                            preferred_element_type=jnp.float32) + fc_b_ref[...])
    m = jnp.dot(m, proj_w_ref[...],
                preferred_element_type=jnp.float32) + proj_b_ref[...]

    o_ref[...] = (h + m).reshape(Bb, S, E)


# ---------------------------------------------------------------------------
# Host-side parameter preparation: fold pre-projections into in_proj and
# pre-split everything per head (all exact algebra, done once outside kernel).
# ---------------------------------------------------------------------------
def _prepare_params(params):
    (ln_g, ln_b, pre_w, pre_b, inp_w, inp_b, outp_w, outp_b,
     fc_w, fc_b, proj_w, proj_b) = params
    E, H, d = EMBED_DIM, NUM_HEADS, HEAD_DIM

    def fuse(pw, pb, a, j):
        # (x @ pw + pb) @ W_in[:, j] + b_in[j]  ==  x @ (pw @ W_in_j) + (pb @ W_in_j + b_in_j)
        win = inp_w[a][:, j * E:(j + 1) * E]          # (E, E)
        bin_ = inp_b[a][j * E:(j + 1) * E]            # (E,)
        w = pw @ win                                  # (E, E)
        b = pb @ win + bin_                           # (E,)
        # Split along the output axis into per-head weights.
        w = w.reshape(E, H, d).transpose(1, 0, 2)     # (H, E, d)
        b = b.reshape(H, d)                           # (H, d)
        return w, b

    wq0, bq0 = fuse(pre_w[0], pre_b[0], 0, 0)   # self q
    wk0, bk0 = fuse(pre_w[1], pre_b[1], 0, 1)   # self k
    wv0, bv0 = fuse(pre_w[2], pre_b[2], 0, 2)   # self v
    wq1, bq1 = fuse(pre_w[3], pre_b[3], 1, 0)   # cross q
    wk1, bk1 = fuse(pre_w[4], pre_b[4], 1, 1)   # cross k
    wv1, bv1 = fuse(pre_w[5], pre_b[5], 1, 2)   # cross v

    wq = jnp.concatenate([wq0, wq1], axis=0)    # (2H, E, d)
    bq = jnp.concatenate([bq0, bq1], axis=0)    # (2H, d)
    wk = jnp.concatenate([wk0, wk1], axis=0)
    bk = jnp.concatenate([bk0, bk1], axis=0)
    wv = jnp.concatenate([wv0, wv1], axis=0)
    bv = jnp.concatenate([bv0, bv1], axis=0)

    # Output projection: rows h*d:(h+1)*d belong to head h.
    wo = outp_w.reshape(2 * H, d, E)            # (2H, d, E)
    bo = outp_b                                 # (2, E)

    return (ln_g, ln_b, wq, bq, wk, bk, wv, bv, wo, bo,
            fc_w, fc_b, proj_w, proj_b)


def cross_block(x, xc, params, *, num_blocks=None):
    B, S, E = x.shape
    _, Sc, _ = xc.shape
    assert E == EMBED_DIM
    if num_blocks is None:
        # 2 parallel blocks feeds both TensorCores on v7x; on v5e/v6e
        # (single TC) pass num_blocks=1 to remove the extra pipeline step.
        num_blocks = min(B, 2)
    assert B % num_blocks == 0
    Bb = B // num_blocks

    kparams = _prepare_params(params)

    def const_spec(shape):
        n = len(shape)
        return pl.BlockSpec(shape, lambda i, _n=n: (0,) * _n)

    in_specs = [
        pl.BlockSpec((Bb, S, E), lambda i: (i, 0, 0)),
        pl.BlockSpec((Bb, Sc, E), lambda i: (i, 0, 0)),
    ] + [const_spec(p.shape) for p in kparams]

    return pl.pallas_call(
        _cross_block_kernel,
        out_shape=jax.ShapeDtypeStruct((B, S, E), jnp.float32),
        grid=(num_blocks,),
        in_specs=in_specs,
        out_specs=pl.BlockSpec((Bb, S, E), lambda i: (i, 0, 0)),
        compiler_params=pltpu.CompilerParams(
            dimension_semantics=("parallel",)),
    )(x, xc, *kparams)


# ---------------------------------------------------------------------------
# Pure-JAX reference using the ORIGINAL (unfused) parameterization, to verify
# that the host-side fusion + per-head restructuring is exact.
# ---------------------------------------------------------------------------
def _mha_ref(q_in, k_in, v_in, w_in, b_in, w_out, b_out):
    E = EMBED_DIM
    q = q_in @ w_in[:, 0 * E:1 * E] + b_in[0 * E:1 * E]
    k = k_in @ w_in[:, 1 * E:2 * E] + b_in[1 * E:2 * E]
    v = v_in @ w_in[:, 2 * E:3 * E] + b_in[2 * E:3 * E]
    scale = 1.0 / math.sqrt(HEAD_DIM)
    outs = []
    for h in range(NUM_HEADS):
        lo, hi = h * HEAD_DIM, (h + 1) * HEAD_DIM
        qh, kh, vh = q[:, lo:hi], k[:, lo:hi], v[:, lo:hi]
        s = jax.lax.dot_general(qh, kh, (((1,), (1,)), ((), ())),
                                preferred_element_type=jnp.float32) * scale
        s = s - jnp.max(s, axis=-1, keepdims=True)
        p = jnp.exp(s)
        p = p / jnp.sum(p, axis=-1, keepdims=True)
        outs.append(jnp.dot(p, vh, preferred_element_type=jnp.float32))
    o = jnp.concatenate(outs, axis=-1)
    return o @ w_out + b_out


def _cross_block_math(x, xc, ln_g, ln_b, pre_w, pre_b,
                      inp_w, inp_b, outp_w, outp_b,
                      fc_w, fc_b, proj_w, proj_b):
    h = _layernorm(x, ln_g[0], ln_b[0])
    q = h @ pre_w[0] + pre_b[0]
    k = h @ pre_w[1] + pre_b[1]
    v = h @ pre_w[2] + pre_b[2]
    h = h + _mha_ref(q, k, v, inp_w[0], inp_b[0], outp_w[0], outp_b[0])
    h = _layernorm(h, ln_g[1], ln_b[1])
    cq = h @ pre_w[3] + pre_b[3]
    ck = xc @ pre_w[4] + pre_b[4]
    cv = xc @ pre_w[5] + pre_b[5]
    h = h + _mha_ref(cq, ck, cv, inp_w[1], inp_b[1], outp_w[1], outp_b[1])
    h = _layernorm(h, ln_g[2], ln_b[2])
    m = _gelu_exact(h @ fc_w + fc_b[0])
    m = m @ proj_w + proj_b[0]
    return h + m


# ---------------------------------------------------------------------------
# Deterministic synthetic parameters (shapes mirror CrossBlock.__init__).
# ---------------------------------------------------------------------------
def init_params(key):
    E = EMBED_DIM
    ks = jax.random.split(key, 12)

    def rnd(k, shape, scale=0.1):
        return (scale * jax.random.normal(k, shape)).astype(jnp.float32)

    ln_g = (1.0 + 0.05 * jax.random.normal(ks[0], (3, E))).astype(jnp.float32)
    ln_b = rnd(ks[1], (3, E), 0.05)                 # ln_1, ln_2, ln_3
    pre_w = rnd(ks[2], (6, E, E))                   # qw, kw, vw, cqw, ckw, cvw
    pre_b = rnd(ks[3], (6, E), 0.05)
    inp_w = rnd(ks[4], (2, E, 3 * E))               # attn / cross_attn in_proj
    inp_b = rnd(ks[5], (2, 3 * E), 0.05)
    outp_w = rnd(ks[6], (2, E, E))                  # attn / cross_attn out_proj
    outp_b = rnd(ks[7], (2, E), 0.05)
    fc_w = rnd(ks[8], (E, 4 * E))                   # c_fc
    fc_b = rnd(ks[9], (1, 4 * E), 0.05)
    proj_w = rnd(ks[10], (4 * E, E))                # c_proj
    proj_b = rnd(ks[11], (1, E), 0.05)
    return (ln_g, ln_b, pre_w, pre_b, inp_w, inp_b, outp_w, outp_b,
            fc_w, fc_b, proj_w, proj_b)


if __name__ == "__main__":
    key = jax.random.PRNGKey(0)
    kx, kc, kp = jax.random.split(key, 3)
    B, S, Sc = 2, 8, 16
    x = jax.random.normal(kx, (B, S, EMBED_DIM), dtype=jnp.float32)
    x_cross = jax.random.normal(kc, (B, Sc, EMBED_DIM), dtype=jnp.float32)
    params = init_params(kp)

    # Default: 2 parallel blocks (v7x-friendly). Also exercise the fully
    # coarsened single-program variant recommended for v5e/v6e.
    out2 = jax.block_until_ready(cross_block(x, x_cross, params))
    out1 = jax.block_until_ready(cross_block(x, x_cross, params, num_blocks=1))
    assert out2.shape == (B, S, EMBED_DIM)
    assert out1.shape == (B, S, EMBED_DIM)

    # Pure-JAX reference with the original, unfused parameterization.
    ref = jax.vmap(_cross_block_math, in_axes=(0, 0) + (None,) * 12)(
        x, x_cross, *params)
    err2 = float(jnp.max(jnp.abs(out2 - ref)))
    err1 = float(jnp.max(jnp.abs(out1 - ref)))
    assert jnp.allclose(out2, ref, rtol=5e-2, atol=5e-2), err2
    assert jnp.allclose(out1, ref, rtol=5e-2, atol=5e-2), err1

    print("KERNEL_OK")
</pallas_src>

<mosaic_0001>
module attributes {stable_mosaic.version = 11 : i64} {
  func.func @_cross_block_kernel(%arg0: i32, %arg1: memref<1x8x32xf32, #tpu.memory_space<vmem>>, %arg2: memref<1x16x32xf32, #tpu.memory_space<vmem>>, %arg3: memref<3x32xf32, #tpu.memory_space<vmem>>, %arg4: memref<3x32xf32, #tpu.memory_space<vmem>>, %arg5: memref<8x32x8xf32, #tpu.memory_space<vmem>>, %arg6: memref<8x8xf32, #tpu.memory_space<vmem>>, %arg7: memref<8x32x8xf32, #tpu.memory_space<vmem>>, %arg8: memref<8x8xf32, #tpu.memory_space<vmem>>, %arg9: memref<8x32x8xf32, #tpu.memory_space<vmem>>, %arg10: memref<8x8xf32, #tpu.memory_space<vmem>>, %arg11: memref<8x8x32xf32, #tpu.memory_space<vmem>>, %arg12: memref<2x32xf32, #tpu.memory_space<vmem>>, %arg13: memref<32x128xf32, #tpu.memory_space<vmem>>, %arg14: memref<1x128xf32, #tpu.memory_space<vmem>>, %arg15: memref<128x32xf32, #tpu.memory_space<vmem>>, %arg16: memref<1x32xf32, #tpu.memory_space<vmem>>, %arg17: memref<1x8x32xf32, #tpu.memory_space<vmem>>) attributes {dimension_semantics = [#tpu.dimension_semantics<parallel>], iteration_bounds = array<i64: 2>, scalar_prefetch = 0 : i64, scratch_operands = 0 : i64, tpu.core_type = #tpu.core_type<tc>, window_params = [{transform_indices = @transform_0, window_bounds = array<i64: 1, 8, 32>}, {transform_indices = @transform_1, window_bounds = array<i64: 1, 16, 32>}, {pipeline_mode = #tpu.pipeline_mode<synchronous>, transform_indices = @transform_2, window_bounds = array<i64: 3, 32>}, {pipeline_mode = #tpu.pipeline_mode<synchronous>, transform_indices = @transform_3, window_bounds = array<i64: 3, 32>}, {pipeline_mode = #tpu.pipeline_mode<synchronous>, transform_indices = @transform_4, window_bounds = array<i64: 8, 32, 8>}, {pipeline_mode = #tpu.pipeline_mode<synchronous>, transform_indices = @transform_5, window_bounds = array<i64: 8, 8>}, {pipeline_mode = #tpu.pipeline_mode<synchronous>, transform_indices = @transform_6, window_bounds = array<i64: 8, 32, 8>}, {pipeline_mode = #tpu.pipeline_mode<synchronous>, transform_indices = @transform_7, window_bounds = array<i64: 8, 8>}, {pipeline_mode = #tpu.pipeline_mode<synchronous>, transform_indices = @transform_8, window_bounds = array<i64: 8, 32, 8>}, {pipeline_mode = #tpu.pipeline_mode<synchronous>, transform_indices = @transform_9, window_bounds = array<i64: 8, 8>}, {pipeline_mode = #tpu.pipeline_mode<synchronous>, transform_indices = @transform_10, window_bounds = array<i64: 8, 8, 32>}, {pipeline_mode = #tpu.pipeline_mode<synchronous>, transform_indices = @transform_11, window_bounds = array<i64: 2, 32>}, {pipeline_mode = #tpu.pipeline_mode<synchronous>, transform_indices = @transform_12, window_bounds = array<i64: 32, 128>}, {pipeline_mode = #tpu.pipeline_mode<synchronous>, transform_indices = @transform_13, window_bounds = array<i64: 1, 128>}, {pipeline_mode = #tpu.pipeline_mode<synchronous>, transform_indices = @transform_14, window_bounds = array<i64: 128, 32>}, {pipeline_mode = #tpu.pipeline_mode<synchronous>, transform_indices = @transform_15, window_bounds = array<i64: 1, 32>}, {transform_indices = @transform_16, window_bounds = array<i64: 1, 8, 32>}]} {
    %c0 = arith.constant 0 : index
    %c0_0 = arith.constant 0 : index
    %c0_1 = arith.constant 0 : index
    %0 = vector.load %arg1[%c0, %c0_0, %c0_1] : memref<1x8x32xf32, #tpu.memory_space<vmem>>, vector<1x8x32xf32>
    %1 = vector.shape_cast %0 : vector<1x8x32xf32> to vector<8x32xf32>
    %c0_2 = arith.constant 0 : index
    %c0_3 = arith.constant 0 : index
    %c0_4 = arith.constant 0 : index
    %2 = vector.load %arg2[%c0_2, %c0_3, %c0_4] : memref<1x16x32xf32, #tpu.memory_space<vmem>>, vector<1x16x32xf32>
    %3 = vector.shape_cast %2 : vector<1x16x32xf32> to vector<16x32xf32>
    %c0_5 = arith.constant 0 : index
    %c0_6 = arith.constant 0 : index
    %4 = vector.load %arg3[%c0_5, %c0_6] : memref<3x32xf32, #tpu.memory_space<vmem>>, vector<3x32xf32>
    %c0_7 = arith.constant 0 : index
    %c0_8 = arith.constant 0 : index
    %5 = vector.load %arg4[%c0_7, %c0_8] : memref<3x32xf32, #tpu.memory_space<vmem>>, vector<3x32xf32>
    %c0_9 = arith.constant 0 : index
    %c0_10 = arith.constant 0 : index
    %c0_11 = arith.constant 0 : index
    %6 = vector.load %arg5[%c0_9, %c0_10, %c0_11] : memref<8x32x8xf32, #tpu.memory_space<vmem>>, vector<8x32x8xf32>
    %c0_12 = arith.constant 0 : index
    %c0_13 = arith.constant 0 : index
    %7 = vector.load %arg6[%c0_12, %c0_13] : memref<8x8xf32, #tpu.memory_space<vmem>>, vector<8x8xf32>
    %c0_14 = arith.constant 0 : index
    %c0_15 = arith.constant 0 : index
    %c0_16 = arith.constant 0 : index
    %8 = vector.load %arg7[%c0_14, %c0_15, %c0_16] : memref<8x32x8xf32, #tpu.memory_space<vmem>>, vector<8x32x8xf32>
    %c0_17 = arith.constant 0 : index
    %c0_18 = arith.constant 0 : index
    %9 = vector.load %arg8[%c0_17, %c0_18] : memref<8x8xf32, #tpu.memory_space<vmem>>, vector<8x8xf32>
    %c0_19 = arith.constant 0 : index
    %c0_20 = arith.constant 0 : index
    %c0_21 = arith.constant 0 : index
    %10 = vector.load %arg9[%c0_19, %c0_20, %c0_21] : memref<8x32x8xf32, #tpu.memory_space<vmem>>, vector<8x32x8xf32>
    %c0_22 = arith.constant 0 : index
    %c0_23 = arith.constant 0 : index
    %11 = vector.load %arg10[%c0_22, %c0_23] : memref<8x8xf32, #tpu.memory_space<vmem>>, vector<8x8xf32>
    %c0_24 = arith.constant 0 : index
    %c0_25 = arith.constant 0 : index
    %c0_26 = arith.constant 0 : index
    %12 = vector.load %arg11[%c0_24, %c0_25, %c0_26] : memref<8x8x32xf32, #tpu.memory_space<vmem>>, vector<8x8x32xf32>
    %c0_27 = arith.constant 0 : index
    %c0_28 = arith.constant 0 : index
    %13 = vector.load %arg12[%c0_27, %c0_28] : memref<2x32xf32, #tpu.memory_space<vmem>>, vector<2x32xf32>
    %14 = vector.extract_strided_slice %4 {offsets = [0, 0], sizes = [1, 32], strides = [1, 1]} : vector<3x32xf32> to vector<1x32xf32>
    %15 = vector.shape_cast %14 : vector<1x32xf32> to vector<32xf32>
    %16 = vector.extract_strided_slice %5 {offsets = [0, 0], sizes = [1, 32], strides = [1, 1]} : vector<3x32xf32> to vector<1x32xf32>
    %17 = vector.shape_cast %16 : vector<1x32xf32> to vector<32xf32>
    %cst = arith.constant dense<0.000000e+00> : vector<8xf32>
    %18 = vector.multi_reduction <add>, %1, %cst [1] : vector<8x32xf32> to vector<8xf32>
    %19 = vector.shape_cast %18 : vector<8xf32> to vector<8x1xf32>
    %cst_29 = arith.constant 3.200000e+01 : f32
    %20 = vector.broadcast %cst_29 : f32 to vector<8x1xf32>
    %21 = arith.divf %19, %20 : vector<8x1xf32>
    %22 = vector.broadcast %21 : vector<8x1xf32> to vector<8x32xf32>
    %23 = arith.subf %1, %22 : vector<8x32xf32>
    %24 = arith.mulf %23, %23 : vector<8x32xf32>
    %cst_30 = arith.constant dense<0.000000e+00> : vector<8xf32>
    %25 = vector.multi_reduction <add>, %24, %cst_30 [1] : vector<8x32xf32> to vector<8xf32>
    %26 = vector.shape_cast %25 : vector<8xf32> to vector<8x1xf32>
    %cst_31 = arith.constant 3.200000e+01 : f32
    %27 = vector.broadcast %cst_31 : f32 to vector<8x1xf32>
    %28 = arith.divf %26, %27 : vector<8x1xf32>
    %29 = vector.broadcast %21 : vector<8x1xf32> to vector<8x32xf32>
    %30 = arith.subf %1, %29 : vector<8x32xf32>
    %cst_32 = arith.constant 9.99999974E-6 : f32
    %31 = vector.broadcast %cst_32 : f32 to vector<8x1xf32>
    %32 = arith.addf %28, %31 : vector<8x1xf32>
    %33 = math.rsqrt %32 : vector<8x1xf32>
    %34 = vector.broadcast %33 : vector<8x1xf32> to vector<8x32xf32>
    %35 = arith.mulf %30, %34 : vector<8x32xf32>
    %36 = vector.shape_cast %15 : vector<32xf32> to vector<1x32xf32>
    %37 = vector.broadcast %36 : vector<1x32xf32> to vector<8x32xf32>
    %38 = arith.mulf %35, %37 : vector<8x32xf32>
    %39 = vector.shape_cast %17 : vector<32xf32> to vector<1x32xf32>
    %40 = vector.broadcast %39 : vector<1x32xf32> to vector<8x32xf32>
    %41 = arith.addf %38, %40 : vector<8x32xf32>
    %42 = vector.extract_strided_slice %6 {offsets = [0, 0, 0], sizes = [1, 32, 8], strides = [1, 1, 1]} : vector<8x32x8xf32> to vector<1x32x8xf32>
    %43 = vector.shape_cast %42 : vector<1x32x8xf32> to vector<32x8xf32>
    %cst_33 = arith.constant dense<0.000000e+00> : vector<8x8xf32>
    %44 = tpu.matmul %41, %43, %cst_33 {dimension_numbers = #tpu.dot_dimension_numbers<[1], [0], [0], [1], [0, 0, 1, 1], [], []>} : vector<8x32xf32>, vector<32x8xf32>, vector<8x8xf32> -> vector<8x8xf32>
    %45 = vector.extract_strided_slice %7 {offsets = [0, 0], sizes = [1, 8], strides = [1, 1]} : vector<8x8xf32> to vector<1x8xf32>
    %46 = vector.shape_cast %45 : vector<1x8xf32> to vector<8xf32>
    %47 = vector.shape_cast %46 : vector<8xf32> to vector<1x8xf32>
    %48 = vector.broadcast %47 : vector<1x8xf32> to vector<8x8xf32>
    %49 = arith.addf %44, %48 : vector<8x8xf32>
    %50 = vector.extract_strided_slice %8 {offsets = [0, 0, 0], sizes = [1, 32, 8], strides = [1, 1, 1]} : vector<8x32x8xf32> to vector<1x32x8xf32>
    %51 = vector.shape_cast %50 : vector<1x32x8xf32> to vector<32x8xf32>
    %cst_34 = arith.constant dense<0.000000e+00> : vector<8x8xf32>
    %52 = tpu.matmul %41, %51, %cst_34 {dimension_numbers = #tpu.dot_dimension_numbers<[1], [0], [0], [1], [0, 0, 1, 1], [], []>} : vector<8x32xf32>, vector<32x8xf32>, vector<8x8xf32> -> vector<8x8xf32>
    %53 = vector.extract_strided_slice %9 {offsets = [0, 0], sizes = [1, 8], strides = [1, 1]} : vector<8x8xf32> to vector<1x8xf32>
    %54 = vector.shape_cast %53 : vector<1x8xf32> to vector<8xf32>
    %55 = vector.shape_cast %54 : vector<8xf32> to vector<1x8xf32>
    %56 = vector.broadcast %55 : vector<1x8xf32> to vector<8x8xf32>
    %57 = arith.addf %52, %56 : vector<8x8xf32>
    %58 = vector.extract_strided_slice %10 {offsets = [0, 0, 0], sizes = [1, 32, 8], strides = [1, 1, 1]} : vector<8x32x8xf32> to vector<1x32x8xf32>
    %59 = vector.shape_cast %58 : vector<1x32x8xf32> to vector<32x8xf32>
    %cst_35 = arith.constant dense<0.000000e+00> : vector<8x8xf32>
    %60 = tpu.matmul %41, %59, %cst_35 {dimension_numbers = #tpu.dot_dimension_numbers<[1], [0], [0], [1], [0, 0, 1, 1], [], []>} : vector<8x32xf32>, vector<32x8xf32>, vector<8x8xf32> -> vector<8x8xf32>
    %61 = vector.extract_strided_slice %11 {offsets = [0, 0], sizes = [1, 8], strides = [1, 1]} : vector<8x8xf32> to vector<1x8xf32>
    %62 = vector.shape_cast %61 : vector<1x8xf32> to vector<8xf32>
    %63 = vector.shape_cast %62 : vector<8xf32> to vector<1x8xf32>
    %64 = vector.broadcast %63 : vector<1x8xf32> to vector<8x8xf32>
    %65 = arith.addf %60, %64 : vector<8x8xf32>
    %66 = vector.extract_strided_slice %6 {offsets = [1, 0, 0], sizes = [1, 32, 8], strides = [1, 1, 1]} : vector<8x32x8xf32> to vector<1x32x8xf32>
    %67 = vector.shape_cast %66 : vector<1x32x8xf32> to vector<32x8xf32>
    %cst_36 = arith.constant dense<0.000000e+00> : vector<8x8xf32>
    %68 = tpu.matmul %41, %67, %cst_36 {dimension_numbers = #tpu.dot_dimension_numbers<[1], [0], [0], [1], [0, 0, 1, 1], [], []>} : vector<8x32xf32>, vector<32x8xf32>, vector<8x8xf32> -> vector<8x8xf32>
    %69 = vector.extract_strided_slice %7 {offsets = [1, 0], sizes = [1, 8], strides = [1, 1]} : vector<8x8xf32> to vector<1x8xf32>
    %70 = vector.shape_cast %69 : vector<1x8xf32> to vector<8xf32>
    %71 = vector.shape_cast %70 : vector<8xf32> to vector<1x8xf32>
    %72 = vector.broadcast %71 : vector<1x8xf32> to vector<8x8xf32>
    %73 = arith.addf %68, %72 : vector<8x8xf32>
    %74 = vector.extract_strided_slice %8 {offsets = [1, 0, 0], sizes = [1, 32, 8], strides = [1, 1, 1]} : vector<8x32x8xf32> to vector<1x32x8xf32>
    %75 = vector.shape_cast %74 : vector<1x32x8xf32> to vector<32x8xf32>
    %cst_37 = arith.constant dense<0.000000e+00> : vector<8x8xf32>
    %76 = tpu.matmul %41, %75, %cst_37 {dimension_numbers = #tpu.dot_dimension_numbers<[1], [0], [0], [1], [0, 0, 1, 1], [], []>} : vector<8x32xf32>, vector<32x8xf32>, vector<8x8xf32> -> vector<8x8xf32>
    %77 = vector.extract_strided_slice %9 {offsets = [1, 0], sizes = [1, 8], strides = [1, 1]} : vector<8x8xf32> to vector<1x8xf32>
    %78 = vector.shape_cast %77 : vector<1x8xf32> to vector<8xf32>
    %79 = vector.shape_cast %78 : vector<8xf32> to vector<1x8xf32>
    %80 = vector.broadcast %79 : vector<1x8xf32> to vector<8x8xf32>
    %81 = arith.addf %76, %80 : vector<8x8xf32>
    %82 = vector.extract_strided_slice %10 {offsets = [1, 0, 0], sizes = [1, 32, 8], strides = [1, 1, 1]} : vector<8x32x8xf32> to vector<1x32x8xf32>
    %83 = vector.shape_cast %82 : vector<1x32x8xf32> to vector<32x8xf32>
    %cst_38 = arith.constant dense<0.000000e+00> : vector<8x8xf32>
    %84 = tpu.matmul %41, %83, %cst_38 {dimension_numbers = #tpu.dot_dimension_numbers<[1], [0], [0], [1], [0, 0, 1, 1], [], []>} : vector<8x32xf32>, vector<32x8xf32>, vector<8x8xf32> -> vector<8x8xf32>
    %85 = vector.extract_strided_slice %11 {offsets = [1, 0], sizes = [1, 8], strides = [1, 1]} : vector<8x8xf32> to vector<1x8xf32>
    %86 = vector.shape_cast %85 : vector<1x8xf32> to vector<8xf32>
    %87 = vector.shape_cast %86 : vector<8xf32> to vector<1x8xf32>
    %88 = vector.broadcast %87 : vector<1x8xf32> to vector<8x8xf32>
    %89 = arith.addf %84, %88 : vector<8x8xf32>
    %90 = vector.extract_strided_slice %6 {offsets = [2, 0, 0], sizes = [1, 32, 8], strides = [1, 1, 1]} : vector<8x32x8xf32> to vector<1x32x8xf32>
    %91 = vector.shape_cast %90 : vector<1x32x8xf32> to vector<32x8xf32>
    %cst_39 = arith.constant dense<0.000000e+00> : vector<8x8xf32>
    %92 = tpu.matmul %41, %91, %cst_39 {dimension_numbers = #tpu.dot_dimension_numbers<[1], [0], [0], [1], [0, 0, 1, 1], [], []>} : vector<8x32xf32>, vector<32x8xf32>, vector<8x8xf32> -> vector<8x8xf32>
    %93 = vector.extract_strided_slice %7 {offsets = [2, 0], sizes = [1, 8], strides = [1, 1]} : vector<8x8xf32> to vector<1x8xf32>
    %94 = vector.shape_cast %93 : vector<1x8xf32> to vector<8xf32>
    %95 = vector.shape_cast %94 : vector<8xf32> to vector<1x8xf32>
    %96 = vector.broadcast %95 : vector<1x8xf32> to vector<8x8xf32>
    %97 = arith.addf %92, %96 : vector<8x8xf32>
    %98 = vector.extract_strided_slice %8 {offsets = [2, 0, 0], sizes = [1, 32, 8], strides = [1, 1, 1]} : vector<8x32x8xf32> to vector<1x32x8xf32>
    %99 = vector.shape_cast %98 : vector<1x32x8xf32> to vector<32x8xf32>
    %cst_40 = arith.constant dense<0.000000e+00> : vector<8x8xf32>
    %100 = tpu.matmul %41, %99, %cst_40 {dimension_numbers = #tpu.dot_dimension_numbers<[1], [0], [0], [1], [0, 0, 1, 1], [], []>} : vector<8x32xf32>, vector<32x8xf32>, vector<8x8xf32> -> vector<8x8xf32>
    %101 = vector.extract_strided_slice %9 {offsets = [2, 0], sizes = [1, 8], strides = [1, 1]} : vector<8x8xf32> to vector<1x8xf32>
    %102 = vector.shape_cast %101 : vector<1x8xf32> to vector<8xf32>
    %103 = vector.shape_cast %102 : vector<8xf32> to vector<1x8xf32>
    %104 = vector.broadcast %103 : vector<1x8xf32> to vector<8x8xf32>
    %105 = arith.addf %100, %104 : vector<8x8xf32>
    %106 = vector.extract_strided_slice %10 {offsets = [2, 0, 0], sizes = [1, 32, 8], strides = [1, 1, 1]} : vector<8x32x8xf32> to vector<1x32x8xf32>
    %107 = vector.shape_cast %106 : vector<1x32x8xf32> to vector<32x8xf32>
    %cst_41 = arith.constant dense<0.000000e+00> : vector<8x8xf32>
    %108 = tpu.matmul %41, %107, %cst_41 {dimension_numbers = #tpu.dot_dimension_numbers<[1], [0], [0], [1], [0, 0, 1, 1], [], []>} : vector<8x32xf32>, vector<32x8xf32>, vector<8x8xf32> -> vector<8x8xf32>
    %109 = vector.extract_strided_slice %11 {offsets = [2, 0], sizes = [1, 8], strides = [1, 1]} : vector<8x8xf32> to vector<1x8xf32>
    %110 = vector.shape_cast %109 : vector<1x8xf32> to vector<8xf32>
    %111 = vector.shape_cast %110 : vector<8xf32> to vector<1x8xf32>
    %112 = vector.broadcast %111 : vector<1x8xf32> to vector<8x8xf32>
    %113 = arith.addf %108, %112 : vector<8x8xf32>
    %114 = vector.extract_strided_slice %6 {offsets = [3, 0, 0], sizes = [1, 32, 8], strides = [1, 1, 1]} : vector<8x32x8xf32> to vector<1x32x8xf32>
    %115 = vector.shape_cast %114 : vector<1x32x8xf32> to vector<32x8xf32>
    %cst_42 = arith.constant dense<0.000000e+00> : vector<8x8xf32>
    %116 = tpu.matmul %41, %115, %cst_42 {dimension_numbers = #tpu.dot_dimension_numbers<[1], [0], [0], [1], [0, 0, 1, 1], [], []>} : vector<8x32xf32>, vector<32x8xf32>, vector<8x8xf32> -> vector<8x8xf32>
    %117 = vector.extract_strided_slice %7 {offsets = [3, 0], sizes = [1, 8], strides = [1, 1]} : vector<8x8xf32> to vector<1x8xf32>
    %118 = vector.shape_cast %117 : vector<1x8xf32> to vector<8xf32>
    %119 = vector.shape_cast %118 : vector<8xf32> to vector<1x8xf32>
    %120 = vector.broadcast %119 : vector<1x8xf32> to vector<8x8xf32>
    %121 = arith.addf %116, %120 : vector<8x8xf32>
    %122 = vector.extract_strided_slice %8 {offsets = [3, 0, 0], sizes = [1, 32, 8], strides = [1, 1, 1]} : vector<8x32x8xf32> to vector<1x32x8xf32>
    %123 = vector.shape_cast %122 : vector<1x32x8xf32> to vector<32x8xf32>
    %cst_43 = arith.constant dense<0.000000e+00> : vector<8x8xf32>
    %124 = tpu.matmul %41, %123, %cst_43 {dimension_numbers = #tpu.dot_dimension_numbers<[1], [0], [0], [1], [0, 0, 1, 1], [], []>} : vector<8x32xf32>, vector<32x8xf32>, vector<8x8xf32> -> vector<8x8xf32>
    %125 = vector.extract_strided_slice %9 {offsets = [3, 0], sizes = [1, 8], strides = [1, 1]} : vector<8x8xf32> to vector<1x8xf32>
    %126 = vector.shape_cast %125 : vector<1x8xf32> to vector<8xf32>
    %127 = vector.shape_cast %126 : vector<8xf32> to vector<1x8xf32>
    %128 = vector.broadcast %127 : vector<1x8xf32> to vector<8x8xf32>
    %129 = arith.addf %124, %128 : vector<8x8xf32>
    %130 = vector.extract_strided_slice %10 {offsets = [3, 0, 0], sizes = [1, 32, 8], strides = [1, 1, 1]} : vector<8x32x8xf32> to vector<1x32x8xf32>
    %131 = vector.shape_cast %130 : vector<1x32x8xf32> to vector<32x8xf32>
    %cst_44 = arith.constant dense<0.000000e+00> : vector<8x8xf32>
    %132 = tpu.matmul %41, %131, %cst_44 {dimension_numbers = #tpu.dot_dimension_numbers<[1], [0], [0], [1], [0, 0, 1, 1], [], []>} : vector<8x32xf32>, vector<32x8xf32>, vector<8x8xf32> -> vector<8x8xf32>
    %133 = vector.extract_strided_slice %11 {offsets = [3, 0], sizes = [1, 8], strides = [1, 1]} : vector<8x8xf32> to vector<1x8xf32>
    %134 = vector.shape_cast %133 : vector<1x8xf32> to vector<8xf32>
    %135 = vector.shape_cast %134 : vector<8xf32> to vector<1x8xf32>
    %136 = vector.broadcast %135 : vector<1x8xf32> to vector<8x8xf32>
    %137 = arith.addf %132, %136 : vector<8x8xf32>
    %cst_45 = arith.constant 0.000000e+00 : f32
    %138 = vector.broadcast %cst_45 : f32 to vector<8x32xf32>
    %cst_46 = arith.constant dense<0.000000e+00> : vector<8x8xf32>
    %139 = tpu.matmul %49, %57, %cst_46 {dimension_numbers = #tpu.dot_dimension_numbers<[1], [1], [0], [0], [0, 0, 1, 0], [], []>} : vector<8x8xf32>, vector<8x8xf32>, vector<8x8xf32> -> vector<8x8xf32>
    %cst_47 = arith.constant 0.353553385 : f32
    %140 = vector.broadcast %cst_47 : f32 to vector<8x8xf32>
    %141 = arith.mulf %139, %140 : vector<8x8xf32>
    %cst_48 = arith.constant dense<0xFF800000> : vector<8xf32>
    %142 = vector.multi_reduction <maximumf>, %141, %cst_48 [1] : vector<8x8xf32> to vector<8xf32>
    %143 = vector.shape_cast %142 : vector<8xf32> to vector<8x1xf32>
    %144 = vector.broadcast %143 : vector<8x1xf32> to vector<8x8xf32>
    %145 = arith.subf %141, %144 : vector<8x8xf32>
    %146 = math.exp %145 : vector<8x8xf32>
    %cst_49 = arith.constant dense<0.000000e+00> : vector<8xf32>
    %147 = vector.multi_reduction <add>, %146, %cst_49 [1] : vector<8x8xf32> to vector<8xf32>
    %148 = vector.shape_cast %147 : vector<8xf32> to vector<8x1xf32>
    %149 = vector.broadcast %148 : vector<8x1xf32> to vector<8x8xf32>
    %150 = arith.divf %146, %149 : vector<8x8xf32>
    %cst_50 = arith.constant dense<0.000000e+00> : vector<8x8xf32>
    %151 = tpu.matmul %150, %65, %cst_50 {dimension_numbers = #tpu.dot_dimension_numbers<[1], [0], [0], [1], [0, 0, 1, 1], [], []>} : vector<8x8xf32>, vector<8x8xf32>, vector<8x8xf32> -> vector<8x8xf32>
    %152 = vector.extract_strided_slice %12 {offsets = [0, 0, 0], sizes = [1, 8, 32], strides = [1, 1, 1]} : vector<8x8x32xf32> to vector<1x8x32xf32>
    %153 = vector.shape_cast %152 : vector<1x8x32xf32> to vector<8x32xf32>
    %cst_51 = arith.constant dense<0.000000e+00> : vector<8x32xf32>
    %154 = tpu.matmul %151, %153, %cst_51 {dimension_numbers = #tpu.dot_dimension_numbers<[1], [0], [0], [1], [0, 0, 1, 1], [], []>} : vector<8x8xf32>, vector<8x32xf32>, vector<8x32xf32> -> vector<8x32xf32>
    %155 = arith.addf %138, %154 : vector<8x32xf32>
    %cst_52 = arith.constant dense<0.000000e+00> : vector<8x8xf32>
    %156 = tpu.matmul %73, %81, %cst_52 {dimension_numbers = #tpu.dot_dimension_numbers<[1], [1], [0], [0], [0, 0, 1, 0], [], []>} : vector<8x8xf32>, vector<8x8xf32>, vector<8x8xf32> -> vector<8x8xf32>
    %cst_53 = arith.constant 0.353553385 : f32
    %157 = vector.broadcast %cst_53 : f32 to vector<8x8xf32>
    %158 = arith.mulf %156, %157 : vector<8x8xf32>
    %cst_54 = arith.constant dense<0xFF800000> : vector<8xf32>
    %159 = vector.multi_reduction <maximumf>, %158, %cst_54 [1] : vector<8x8xf32> to vector<8xf32>
    %160 = vector.shape_cast %159 : vector<8xf32> to vector<8x1xf32>
    %161 = vector.broadcast %160 : vector<8x1xf32> to vector<8x8xf32>
    %162 = arith.subf %158, %161 : vector<8x8xf32>
    %163 = math.exp %162 : vector<8x8xf32>
    %cst_55 = arith.constant dense<0.000000e+00> : vector<8xf32>
    %164 = vector.multi_reduction <add>, %163, %cst_55 [1] : vector<8x8xf32> to vector<8xf32>
    %165 = vector.shape_cast %164 : vector<8xf32> to vector<8x1xf32>
    %166 = vector.broadcast %165 : vector<8x1xf32> to vector<8x8xf32>
    %167 = arith.divf %163, %166 : vector<8x8xf32>
    %cst_56 = arith.constant dense<0.000000e+00> : vector<8x8xf32>
    %168 = tpu.matmul %167, %89, %cst_56 {dimension_numbers = #tpu.dot_dimension_numbers<[1], [0], [0], [1], [0, 0, 1, 1], [], []>} : vector<8x8xf32>, vector<8x8xf32>, vector<8x8xf32> -> vector<8x8xf32>
    %169 = vector.extract_strided_slice %12 {offsets = [1, 0, 0], sizes = [1, 8, 32], strides = [1, 1, 1]} : vector<8x8x32xf32> to vector<1x8x32xf32>
    %170 = vector.shape_cast %169 : vector<1x8x32xf32> to vector<8x32xf32>
    %cst_57 = arith.constant dense<0.000000e+00> : vector<8x32xf32>
    %171 = tpu.matmul %168, %170, %cst_57 {dimension_numbers = #tpu.dot_dimension_numbers<[1], [0], [0], [1], [0, 0, 1, 1], [], []>} : vector<8x8xf32>, vector<8x32xf32>, vector<8x32xf32> -> vector<8x32xf32>
    %172 = arith.addf %155, %171 : vector<8x32xf32>
    %cst_58 = arith.constant dense<0.000000e+00> : vector<8x8xf32>
    %173 = tpu.matmul %97, %105, %cst_58 {dimension_numbers = #tpu.dot_dimension_numbers<[1], [1], [0], [0], [0, 0, 1, 0], [], []>} : vector<8x8xf32>, vector<8x8xf32>, vector<8x8xf32> -> vector<8x8xf32>
    %cst_59 = arith.constant 0.353553385 : f32
    %174 = vector.broadcast %cst_59 : f32 to vector<8x8xf32>
    %175 = arith.mulf %173, %174 : vector<8x8xf32>
    %cst_60 = arith.constant dense<0xFF800000> : vector<8xf32>
    %176 = vector.multi_reduction <maximumf>, %175, %cst_60 [1] : vector<8x8xf32> to vector<8xf32>
    %177 = vector.shape_cast %176 : vector<8xf32> to vector<8x1xf32>
    %178 = vector.broadcast %177 : vector<8x1xf32> to vector<8x8xf32>
    %179 = arith.subf %175, %178 : vector<8x8xf32>
    %180 = math.exp %179 : vector<8x8xf32>
    %cst_61 = arith.constant dense<0.000000e+00> : vector<8xf32>
    %181 = vector.multi_reduction <add>, %180, %cst_61 [1] : vector<8x8xf32> to vector<8xf32>
    %182 = vector.shape_cast %181 : vector<8xf32> to vector<8x1xf32>
    %183 = vector.broadcast %182 : vector<8x1xf32> to vector<8x8xf32>
    %184 = arith.divf %180, %183 : vector<8x8xf32>
    %cst_62 = arith.constant dense<0.000000e+00> : vector<8x8xf32>
    %185 = tpu.matmul %184, %113, %cst_62 {dimension_numbers = #tpu.dot_dimension_numbers<[1], [0], [0], [1], [0, 0, 1, 1], [], []>} : vector<8x8xf32>, vector<8x8xf32>, vector<8x8xf32> -> vector<8x8xf32>
    %186 = vector.extract_strided_slice %12 {offsets = [2, 0, 0], sizes = [1, 8, 32], strides = [1, 1, 1]} : vector<8x8x32xf32> to vector<1x8x32xf32>
    %187 = vector.shape_cast %186 : vector<1x8x32xf32> to vector<8x32xf32>
    %cst_63 = arith.constant dense<0.000000e+00> : vector<8x32xf32>
    %188 = tpu.matmul %185, %187, %cst_63 {dimension_numbers = #tpu.dot_dimension_numbers<[1], [0], [0], [1], [0, 0, 1, 1], [], []>} : vector<8x8xf32>, vector<8x32xf32>, vector<8x32xf32> -> vector<8x32xf32>
    %189 = arith.addf %172, %188 : vector<8x32xf32>
    %cst_64 = arith.constant dense<0.000000e+00> : vector<8x8xf32>
    %190 = tpu.matmul %121, %129, %cst_64 {dimension_numbers = #tpu.dot_dimension_numbers<[1], [1], [0], [0], [0, 0, 1, 0], [], []>} : vector<8x8xf32>, vector<8x8xf32>, vector<8x8xf32> -> vector<8x8xf32>
    %cst_65 = arith.constant 0.353553385 : f32
    %191 = vector.broadcast %cst_65 : f32 to vector<8x8xf32>
    %192 = arith.mulf %190, %191 : vector<8x8xf32>
    %cst_66 = arith.constant dense<0xFF800000> : vector<8xf32>
    %193 = vector.multi_reduction <maximumf>, %192, %cst_66 [1] : vector<8x8xf32> to vector<8xf32>
    %194 = vector.shape_cast %193 : vector<8xf32> to vector<8x1xf32>
    %195 = vector.broadcast %194 : vector<8x1xf32> to vector<8x8xf32>
    %196 = arith.subf %192, %195 : vector<8x8xf32>
    %197 = math.exp %196 : vector<8x8xf32>
    %cst_67 = arith.constant dense<0.000000e+00> : vector<8xf32>
    %198 = vector.multi_reduction <add>, %197, %cst_67 [1] : vector<8x8xf32> to vector<8xf32>
    %199 = vector.shape_cast %198 : vector<8xf32> to vector<8x1xf32>
    %200 = vector.broadcast %199 : vector<8x1xf32> to vector<8x8xf32>
    %201 = arith.divf %197, %200 : vector<8x8xf32>
    %cst_68 = arith.constant dense<0.000000e+00> : vector<8x8xf32>
    %202 = tpu.matmul %201, %137, %cst_68 {dimension_numbers = #tpu.dot_dimension_numbers<[1], [0], [0], [1], [0, 0, 1, 1], [], []>} : vector<8x8xf32>, vector<8x8xf32>, vector<8x8xf32> -> vector<8x8xf32>
    %203 = vector.extract_strided_slice %12 {offsets = [3, 0, 0], sizes = [1, 8, 32], strides = [1, 1, 1]} : vector<8x8x32xf32> to vector<1x8x32xf32>
    %204 = vector.shape_cast %203 : vector<1x8x32xf32> to vector<8x32xf32>
    %cst_69 = arith.constant dense<0.000000e+00> : vector<8x32xf32>
    %205 = tpu.matmul %202, %204, %cst_69 {dimension_numbers = #tpu.dot_dimension_numbers<[1], [0], [0], [1], [0, 0, 1, 1], [], []>} : vector<8x8xf32>, vector<8x32xf32>, vector<8x32xf32> -> vector<8x32xf32>
    %206 = arith.addf %189, %205 : vector<8x32xf32>
    %207 = vector.extract_strided_slice %13 {offsets = [0, 0], sizes = [1, 32], strides = [1, 1]} : vector<2x32xf32> to vector<1x32xf32>
    %208 = vector.shape_cast %207 : vector<1x32xf32> to vector<32xf32>
    %209 = vector.shape_cast %208 : vector<32xf32> to vector<1x32xf32>
    %210 = vector.broadcast %209 : vector<1x32xf32> to vector<8x32xf32>
    %211 = arith.addf %206, %210 : vector<8x32xf32>
    %212 = arith.addf %41, %211 : vector<8x32xf32>
    %213 = vector.extract_strided_slice %4 {offsets = [1, 0], sizes = [1, 32], strides = [1, 1]} : vector<3x32xf32> to vector<1x32xf32>
    %214 = vector.shape_cast %213 : vector<1x32xf32> to vector<32xf32>
    %215 = vector.extract_strided_slice %5 {offsets = [1, 0], sizes = [1, 32], strides = [1, 1]} : vector<3x32xf32> to vector<1x32xf32>
    %216 = vector.shape_cast %215 : vector<1x32xf32> to vector<32xf32>
    %cst_70 = arith.constant dense<0.000000e+00> : vector<8xf32>
    %217 = vector.multi_reduction <add>, %212, %cst_70 [1] : vector<8x32xf32> to vector<8xf32>
    %218 = vector.shape_cast %217 : vector<8xf32> to vector<8x1xf32>
    %cst_71 = arith.constant 3.200000e+01 : f32
    %219 = vector.broadcast %cst_71 : f32 to vector<8x1xf32>
    %220 = arith.divf %218, %219 : vector<8x1xf32>
    %221 = vector.broadcast %220 : vector<8x1xf32> to vector<8x32xf32>
    %222 = arith.subf %212, %221 : vector<8x32xf32>
    %223 = arith.mulf %222, %222 : vector<8x32xf32>
    %cst_72 = arith.constant dense<0.000000e+00> : vector<8xf32>
    %224 = vector.multi_reduction <add>, %223, %cst_72 [1] : vector<8x32xf32> to vector<8xf32>
    %225 = vector.shape_cast %224 : vector<8xf32> to vector<8x1xf32>
    %cst_73 = arith.constant 3.200000e+01 : f32
    %226 = vector.broadcast %cst_73 : f32 to vector<8x1xf32>
    %227 = arith.divf %225, %226 : vector<8x1xf32>
    %228 = vector.broadcast %220 : vector<8x1xf32> to vector<8x32xf32>
    %229 = arith.subf %212, %228 : vector<8x32xf32>
    %cst_74 = arith.constant 9.99999974E-6 : f32
    %230 = vector.broadcast %cst_74 : f32 to vector<8x1xf32>
    %231 = arith.addf %227, %230 : vector<8x1xf32>
    %232 = math.rsqrt %231 : vector<8x1xf32>
    %233 = vector.broadcast %232 : vector<8x1xf32> to vector<8x32xf32>
    %234 = arith.mulf %229, %233 : vector<8x32xf32>
    %235 = vector.shape_cast %214 : vector<32xf32> to vector<1x32xf32>
    %236 = vector.broadcast %235 : vector<1x32xf32> to vector<8x32xf32>
    %237 = arith.mulf %234, %236 : vector<8x32xf32>
    %238 = vector.shape_cast %216 : vector<32xf32> to vector<1x32xf32>
    %239 = vector.broadcast %238 : vector<1x32xf32> to vector<8x32xf32>
    %240 = arith.addf %237, %239 : vector<8x32xf32>
    %241 = vector.extract_strided_slice %6 {offsets = [4, 0, 0], sizes = [1, 32, 8], strides = [1, 1, 1]} : vector<8x32x8xf32> to vector<1x32x8xf32>
    %242 = vector.shape_cast %241 : vector<1x32x8xf32> to vector<32x8xf32>
    %cst_75 = arith.constant dense<0.000000e+00> : vector<8x8xf32>
    %243 = tpu.matmul %240, %242, %cst_75 {dimension_numbers = #tpu.dot_dimension_numbers<[1], [0], [0], [1], [0, 0, 1, 1], [], []>} : vector<8x32xf32>, vector<32x8xf32>, vector<8x8xf32> -> vector<8x8xf32>
    %244 = vector.extract_strided_slice %7 {offsets = [4, 0], sizes = [1, 8], strides = [1, 1]} : vector<8x8xf32> to vector<1x8xf32>
    %245 = vector.shape_cast %244 : vector<1x8xf32> to vector<8xf32>
    %246 = vector.shape_cast %245 : vector<8xf32> to vector<1x8xf32>
    %247 = vector.broadcast %246 : vector<1x8xf32> to vector<8x8xf32>
    %248 = arith.addf %243, %247 : vector<8x8xf32>
    %249 = vector.extract_strided_slice %8 {offsets = [4, 0, 0], sizes = [1, 32, 8], strides = [1, 1, 1]} : vector<8x32x8xf32> to vector<1x32x8xf32>
    %250 = vector.shape_cast %249 : vector<1x32x8xf32> to vector<32x8xf32>
    %cst_76 = arith.constant dense<0.000000e+00> : vector<16x8xf32>
    %251 = tpu.matmul %3, %250, %cst_76 {dimension_numbers = #tpu.dot_dimension_numbers<[1], [0], [0], [1], [0, 0, 1, 1], [], []>} : vector<16x32xf32>, vector<32x8xf32>, vector<16x8xf32> -> vector<16x8xf32>
    %252 = vector.extract_strided_slice %9 {offsets = [4, 0], sizes = [1, 8], strides = [1, 1]} : vector<8x8xf32> to vector<1x8xf32>
    %253 = vector.shape_cast %252 : vector<1x8xf32> to vector<8xf32>
    %254 = vector.shape_cast %253 : vector<8xf32> to vector<1x8xf32>
    %255 = vector.broadcast %254 : vector<1x8xf32> to vector<16x8xf32>
    %256 = arith.addf %251, %255 : vector<16x8xf32>
    %257 = vector.extract_strided_slice %10 {offsets = [4, 0, 0], sizes = [1, 32, 8], strides = [1, 1, 1]} : vector<8x32x8xf32> to vector<1x32x8xf32>
    %258 = vector.shape_cast %257 : vector<1x32x8xf32> to vector<32x8xf32>
    %cst_77 = arith.constant dense<0.000000e+00> : vector<16x8xf32>
    %259 = tpu.matmul %3, %258, %cst_77 {dimension_numbers = #tpu.dot_dimension_numbers<[1], [0], [0], [1], [0, 0, 1, 1], [], []>} : vector<16x32xf32>, vector<32x8xf32>, vector<16x8xf32> -> vector<16x8xf32>
    %260 = vector.extract_strided_slice %11 {offsets = [4, 0], sizes = [1, 8], strides = [1, 1]} : vector<8x8xf32> to vector<1x8xf32>
    %261 = vector.shape_cast %260 : vector<1x8xf32> to vector<8xf32>
    %262 = vector.shape_cast %261 : vector<8xf32> to vector<1x8xf32>
    %263 = vector.broadcast %262 : vector<1x8xf32> to vector<16x8xf32>
    %264 = arith.addf %259, %263 : vector<16x8xf32>
    %265 = vector.extract_strided_slice %6 {offsets = [5, 0, 0], sizes = [1, 32, 8], strides = [1, 1, 1]} : vector<8x32x8xf32> to vector<1x32x8xf32>
    %266 = vector.shape_cast %265 : vector<1x32x8xf32> to vector<32x8xf32>
    %cst_78 = arith.constant dense<0.000000e+00> : vector<8x8xf32>
    %267 = tpu.matmul %240, %266, %cst_78 {dimension_numbers = #tpu.dot_dimension_numbers<[1], [0], [0], [1], [0, 0, 1, 1], [], []>} : vector<8x32xf32>, vector<32x8xf32>, vector<8x8xf32> -> vector<8x8xf32>
    %268 = vector.extract_strided_slice %7 {offsets = [5, 0], sizes = [1, 8], strides = [1, 1]} : vector<8x8xf32> to vector<1x8xf32>
    %269 = vector.shape_cast %268 : vector<1x8xf32> to vector<8xf32>
    %270 = vector.shape_cast %269 : vector<8xf32> to vector<1x8xf32>
    %271 = vector.broadcast %270 : vector<1x8xf32> to vector<8x8xf32>
    %272 = arith.addf %267, %271 : vector<8x8xf32>
    %273 = vector.extract_strided_slice %8 {offsets = [5, 0, 0], sizes = [1, 32, 8], strides = [1, 1, 1]} : vector<8x32x8xf32> to vector<1x32x8xf32>
    %274 = vector.shape_cast %273 : vector<1x32x8xf32> to vector<32x8xf32>
    %cst_79 = arith.constant dense<0.000000e+00> : vector<16x8xf32>
    %275 = tpu.matmul %3, %274, %cst_79 {dimension_numbers = #tpu.dot_dimension_numbers<[1], [0], [0], [1], [0, 0, 1, 1], [], []>} : vector<16x32xf32>, vector<32x8xf32>, vector<16x8xf32> -> vector<16x8xf32>
    %276 = vector.extract_strided_slice %9 {offsets = [5, 0], sizes = [1, 8], strides = [1, 1]} : vector<8x8xf32> to vector<1x8xf32>
    %277 = vector.shape_cast %276 : vector<1x8xf32> to vector<8xf32>
    %278 = vector.shape_cast %277 : vector<8xf32> to vector<1x8xf32>
    %279 = vector.broadcast %278 : vector<1x8xf32> to vector<16x8xf32>
    %280 = arith.addf %275, %279 : vector<16x8xf32>
    %281 = vector.extract_strided_slice %10 {offsets = [5, 0, 0], sizes = [1, 32, 8], strides = [1, 1, 1]} : vector<8x32x8xf32> to vector<1x32x8xf32>
    %282 = vector.shape_cast %281 : vector<1x32x8xf32> to vector<32x8xf32>
    %cst_80 = arith.constant dense<0.000000e+00> : vector<16x8xf32>
    %283 = tpu.matmul %3, %282, %cst_80 {dimension_numbers = #tpu.dot_dimension_numbers<[1], [0], [0], [1], [0, 0, 1, 1], [], []>} : vector<16x32xf32>, vector<32x8xf32>, vector<16x8xf32> -> vector<16x8xf32>
    %284 = vector.extract_strided_slice %11 {offsets = [5, 0], sizes = [1, 8], strides = [1, 1]} : vector<8x8xf32> to vector<1x8xf32>
    %285 = vector.shape_cast %284 : vector<1x8xf32> to vector<8xf32>
    %286 = vector.shape_cast %285 : vector<8xf32> to vector<1x8xf32>
    %287 = vector.broadcast %286 : vector<1x8xf32> to vector<16x8xf32>
    %288 = arith.addf %283, %287 : vector<16x8xf32>
    %289 = vector.extract_strided_slice %6 {offsets = [6, 0, 0], sizes = [1, 32, 8], strides = [1, 1, 1]} : vector<8x32x8xf32> to vector<1x32x8xf32>
    %290 = vector.shape_cast %289 : vector<1x32x8xf32> to vector<32x8xf32>
    %cst_81 = arith.constant dense<0.000000e+00> : vector<8x8xf32>
    %291 = tpu.matmul %240, %290, %cst_81 {dimension_numbers = #tpu.dot_dimension_numbers<[1], [0], [0], [1], [0, 0, 1, 1], [], []>} : vector<8x32xf32>, vector<32x8xf32>, vector<8x8xf32> -> vector<8x8xf32>
    %292 = vector.extract_strided_slice %7 {offsets = [6, 0], sizes = [1, 8], strides = [1, 1]} : vector<8x8xf32> to vector<1x8xf32>
    %293 = vector.shape_cast %292 : vector<1x8xf32> to vector<8xf32>
    %294 = vector.shape_cast %293 : vector<8xf32> to vector<1x8xf32>
    %295 = vector.broadcast %294 : vector<1x8xf32> to vector<8x8xf32>
    %296 = arith.addf %291, %295 : vector<8x8xf32>
    %297 = vector.extract_strided_slice %8 {offsets = [6, 0, 0], sizes = [1, 32, 8], strides = [1, 1, 1]} : vector<8x32x8xf32> to vector<1x32x8xf32>
    %298 = vector.shape_cast %297 : vector<1x32x8xf32> to vector<32x8xf32>
    %cst_82 = arith.constant dense<0.000000e+00> : vector<16x8xf32>
    %299 = tpu.matmul %3, %298, %cst_82 {dimension_numbers = #tpu.dot_dimension_numbers<[1], [0], [0], [1], [0, 0, 1, 1], [], []>} : vector<16x32xf32>, vector<32x8xf32>, vector<16x8xf32> -> vector<16x8xf32>
    %300 = vector.extract_strided_slice %9 {offsets = [6, 0], sizes = [1, 8], strides = [1, 1]} : vector<8x8xf32> to vector<1x8xf32>
    %301 = vector.shape_cast %300 : vector<1x8xf32> to vector<8xf32>
    %302 = vector.shape_cast %301 : vector<8xf32> to vector<1x8xf32>
    %303 = vector.broadcast %302 : vector<1x8xf32> to vector<16x8xf32>
    %304 = arith.addf %299, %303 : vector<16x8xf32>
    %305 = vector.extract_strided_slice %10 {offsets = [6, 0, 0], sizes = [1, 32, 8], strides = [1, 1, 1]} : vector<8x32x8xf32> to vector<1x32x8xf32>
    %306 = vector.shape_cast %305 : vector<1x32x8xf32> to vector<32x8xf32>
    %cst_83 = arith.constant dense<0.000000e+00> : vector<16x8xf32>
    %307 = tpu.matmul %3, %306, %cst_83 {dimension_numbers = #tpu.dot_dimension_numbers<[1], [0], [0], [1], [0, 0, 1, 1], [], []>} : vector<16x32xf32>, vector<32x8xf32>, vector<16x8xf32> -> vector<16x8xf32>
    %308 = vector.extract_strided_slice %11 {offsets = [6, 0], sizes = [1, 8], strides = [1, 1]} : vector<8x8xf32> to vector<1x8xf32>
    %309 = vector.shape_cast %308 : vector<1x8xf32> to vector<8xf32>
    %310 = vector.shape_cast %309 : vector<8xf32> to vector<1x8xf32>
    %311 = vector.broadcast %310 : vector<1x8xf32> to vector<16x8xf32>
    %312 = arith.addf %307, %311 : vector<16x8xf32>
    %313 = vector.extract_strided_slice %6 {offsets = [7, 0, 0], sizes = [1, 32, 8], strides = [1, 1, 1]} : vector<8x32x8xf32> to vector<1x32x8xf32>
    %314 = vector.shape_cast %313 : vector<1x32x8xf32> to vector<32x8xf32>
    %cst_84 = arith.constant dense<0.000000e+00> : vector<8x8xf32>
    %315 = tpu.matmul %240, %314, %cst_84 {dimension_numbers = #tpu.dot_dimension_numbers<[1], [0], [0], [1], [0, 0, 1, 1], [], []>} : vector<8x32xf32>, vector<32x8xf32>, vector<8x8xf32> -> vector<8x8xf32>
    %316 = vector.extract_strided_slice %7 {offsets = [7, 0], sizes = [1, 8], strides = [1, 1]} : vector<8x8xf32> to vector<1x8xf32>
    %317 = vector.shape_cast %316 : vector<1x8xf32> to vector<8xf32>
    %318 = vector.shape_cast %317 : vector<8xf32> to vector<1x8xf32>
    %319 = vector.broadcast %318 : vector<1x8xf32> to vector<8x8xf32>
    %320 = arith.addf %315, %319 : vector<8x8xf32>
    %321 = vector.extract_strided_slice %8 {offsets = [7, 0, 0], sizes = [1, 32, 8], strides = [1, 1, 1]} : vector<8x32x8xf32> to vector<1x32x8xf32>
    %322 = vector.shape_cast %321 : vector<1x32x8xf32> to vector<32x8xf32>
    %cst_85 = arith.constant dense<0.000000e+00> : vector<16x8xf32>
    %323 = tpu.matmul %3, %322, %cst_85 {dimension_numbers = #tpu.dot_dimension_numbers<[1], [0], [0], [1], [0, 0, 1, 1], [], []>} : vector<16x32xf32>, vector<32x8xf32>, vector<16x8xf32> -> vector<16x8xf32>
    %324 = vector.extract_strided_slice %9 {offsets = [7, 0], sizes = [1, 8], strides = [1, 1]} : vector<8x8xf32> to vector<1x8xf32>
    %325 = vector.shape_cast %324 : vector<1x8xf32> to vector<8xf32>
    %326 = vector.shape_cast %325 : vector<8xf32> to vector<1x8xf32>
    %327 = vector.broadcast %326 : vector<1x8xf32> to vector<16x8xf32>
    %328 = arith.addf %323, %327 : vector<16x8xf32>
    %329 = vector.extract_strided_slice %10 {offsets = [7, 0, 0], sizes = [1, 32, 8], strides = [1, 1, 1]} : vector<8x32x8xf32> to vector<1x32x8xf32>
    %330 = vector.shape_cast %329 : vector<1x32x8xf32> to vector<32x8xf32>
    %cst_86 = arith.constant dense<0.000000e+00> : vector<16x8xf32>
    %331 = tpu.matmul %3, %330, %cst_86 {dimension_numbers = #tpu.dot_dimension_numbers<[1], [0], [0], [1], [0, 0, 1, 1], [], []>} : vector<16x32xf32>, vector<32x8xf32>, vector<16x8xf32> -> vector<16x8xf32>
    %332 = vector.extract_strided_slice %11 {offsets = [7, 0], sizes = [1, 8], strides = [1, 1]} : vector<8x8xf32> to vector<1x8xf32>
    %333 = vector.shape_cast %332 : vector<1x8xf32> to vector<8xf32>
    %334 = vector.shape_cast %333 : vector<8xf32> to vector<1x8xf32>
    %335 = vector.broadcast %334 : vector<1x8xf32> to vector<16x8xf32>
    %336 = arith.addf %331, %335 : vector<16x8xf32>
    %cst_87 = arith.constant 0.000000e+00 : f32
    %337 = vector.broadcast %cst_87 : f32 to vector<8x32xf32>
    %cst_88 = arith.constant dense<0.000000e+00> : vector<8x16xf32>
    %338 = tpu.matmul %248, %256, %cst_88 {dimension_numbers = #tpu.dot_dimension_numbers<[1], [1], [0], [0], [0, 0, 1, 0], [], []>} : vector<8x8xf32>, vector<16x8xf32>, vector<8x16xf32> -> vector<8x16xf32>
    %cst_89 = arith.constant 0.353553385 : f32
    %339 = vector.broadcast %cst_89 : f32 to vector<8x16xf32>
    %340 = arith.mulf %338, %339 : vector<8x16xf32>
    %cst_90 = arith.constant dense<0xFF800000> : vector<8xf32>
    %341 = vector.multi_reduction <maximumf>, %340, %cst_90 [1] : vector<8x16xf32> to vector<8xf32>
    %342 = vector.shape_cast %341 : vector<8xf32> to vector<8x1xf32>
    %343 = vector.broadcast %342 : vector<8x1xf32> to vector<8x16xf32>
    %344 = arith.subf %340, %343 : vector<8x16xf32>
    %345 = math.exp %344 : vector<8x16xf32>
    %cst_91 = arith.constant dense<0.000000e+00> : vector<8xf32>
    %346 = vector.multi_reduction <add>, %345, %cst_91 [1] : vector<8x16xf32> to vector<8xf32>
    %347 = vector.shape_cast %346 : vector<8xf32> to vector<8x1xf32>
    %348 = vector.broadcast %347 : vector<8x1xf32> to vector<8x16xf32>
    %349 = arith.divf %345, %348 : vector<8x16xf32>
    %cst_92 = arith.constant dense<0.000000e+00> : vector<8x8xf32>
    %350 = tpu.matmul %349, %264, %cst_92 {dimension_numbers = #tpu.dot_dimension_numbers<[1], [0], [0], [1], [0, 0, 1, 1], [], []>} : vector<8x16xf32>, vector<16x8xf32>, vector<8x8xf32> -> vector<8x8xf32>
    %351 = vector.extract_strided_slice %12 {offsets = [4, 0, 0], sizes = [1, 8, 32], strides = [1, 1, 1]} : vector<8x8x32xf32> to vector<1x8x32xf32>
    %352 = vector.shape_cast %351 : vector<1x8x32xf32> to vector<8x32xf32>
    %cst_93 = arith.constant dense<0.000000e+00> : vector<8x32xf32>
    %353 = tpu.matmul %350, %352, %cst_93 {dimension_numbers = #tpu.dot_dimension_numbers<[1], [0], [0], [1], [0, 0, 1, 1], [], []>} : vector<8x8xf32>, vector<8x32xf32>, vector<8x32xf32> -> vector<8x32xf32>
    %354 = arith.addf %337, %353 : vector<8x32xf32>
    %cst_94 = arith.constant dense<0.000000e+00> : vector<8x16xf32>
    %355 = tpu.matmul %272, %280, %cst_94 {dimension_numbers = #tpu.dot_dimension_numbers<[1], [1], [0], [0], [0, 0, 1, 0], [], []>} : vector<8x8xf32>, vector<16x8xf32>, vector<8x16xf32> -> vector<8x16xf32>
    %cst_95 = arith.constant 0.353553385 : f32
    %356 = vector.broadcast %cst_95 : f32 to vector<8x16xf32>
    %357 = arith.mulf %355, %356 : vector<8x16xf32>
    %cst_96 = arith.constant dense<0xFF800000> : vector<8xf32>
    %358 = vector.multi_reduction <maximumf>, %357, %cst_96 [1] : vector<8x16xf32> to vector<8xf32>
    %359 = vector.shape_cast %358 : vector<8xf32> to vector<8x1xf32>
    %360 = vector.broadcast %359 : vector<8x1xf32> to vector<8x16xf32>
    %361 = arith.subf %357, %360 : vector<8x16xf32>
    %362 = math.exp %361 : vector<8x16xf32>
    %cst_97 = arith.constant dense<0.000000e+00> : vector<8xf32>
    %363 = vector.multi_reduction <add>, %362, %cst_97 [1] : vector<8x16xf32> to vector<8xf32>
    %364 = vector.shape_cast %363 : vector<8xf32> to vector<8x1xf32>
    %365 = vector.broadcast %364 : vector<8x1xf32> to vector<8x16xf32>
    %366 = arith.divf %362, %365 : vector<8x16xf32>
    %cst_98 = arith.constant dense<0.000000e+00> : vector<8x8xf32>
    %367 = tpu.matmul %366, %288, %cst_98 {dimension_numbers = #tpu.dot_dimension_numbers<[1], [0], [0], [1], [0, 0, 1, 1], [], []>} : vector<8x16xf32>, vector<16x8xf32>, vector<8x8xf32> -> vector<8x8xf32>
    %368 = vector.extract_strided_slice %12 {offsets = [5, 0, 0], sizes = [1, 8, 32], strides = [1, 1, 1]} : vector<8x8x32xf32> to vector<1x8x32xf32>
    %369 = vector.shape_cast %368 : vector<1x8x32xf32> to vector<8x32xf32>
    %cst_99 = arith.constant dense<0.000000e+00> : vector<8x32xf32>
    %370 = tpu.matmul %367, %369, %cst_99 {dimension_numbers = #tpu.dot_dimension_numbers<[1], [0], [0], [1], [0, 0, 1, 1], [], []>} : vector<8x8xf32>, vector<8x32xf32>, vector<8x32xf32> -> vector<8x32xf32>
    %371 = arith.addf %354, %370 : vector<8x32xf32>
    %cst_100 = arith.constant dense<0.000000e+00> : vector<8x16xf32>
    %372 = tpu.matmul %296, %304, %cst_100 {dimension_numbers = #tpu.dot_dimension_numbers<[1], [1], [0], [0], [0, 0, 1, 0], [], []>} : vector<8x8xf32>, vector<16x8xf32>, vector<8x16xf32> -> vector<8x16xf32>
    %cst_101 = arith.constant 0.353553385 : f32
    %373 = vector.broadcast %cst_101 : f32 to vector<8x16xf32>
    %374 = arith.mulf %372, %373 : vector<8x16xf32>
    %cst_102 = arith.constant dense<0xFF800000> : vector<8xf32>
    %375 = vector.multi_reduction <maximumf>, %374, %cst_102 [1] : vector<8x16xf32> to vector<8xf32>
    %376 = vector.shape_cast %375 : vector<8xf32> to vector<8x1xf32>
    %377 = vector.broadcast %376 : vector<8x1xf32> to vector<8x16xf32>
    %378 = arith.subf %374, %377 : vector<8x16xf32>
    %379 = math.exp %378 : vector<8x16xf32>
    %cst_103 = arith.constant dense<0.000000e+00> : vector<8xf32>
    %380 = vector.multi_reduction <add>, %379, %cst_103 [1] : vector<8x16xf32> to vector<8xf32>
    %381 = vector.shape_cast %380 : vector<8xf32> to vector<8x1xf32>
    %382 = vector.broadcast %381 : vector<8x1xf32> to vector<8x16xf32>
    %383 = arith.divf %379, %382 : vector<8x16xf32>
    %cst_104 = arith.constant dense<0.000000e+00> : vector<8x8xf32>
    %384 = tpu.matmul %383, %312, %cst_104 {dimension_numbers = #tpu.dot_dimension_numbers<[1], [0], [0], [1], [0, 0, 1, 1], [], []>} : vector<8x16xf32>, vector<16x8xf32>, vector<8x8xf32> -> vector<8x8xf32>
    %385 = vector.extract_strided_slice %12 {offsets = [6, 0, 0], sizes = [1, 8, 32], strides = [1, 1, 1]} : vector<8x8x32xf32> to vector<1x8x32xf32>
    %386 = vector.shape_cast %385 : vector<1x8x32xf32> to vector<8x32xf32>
    %cst_105 = arith.constant dense<0.000000e+00> : vector<8x32xf32>
    %387 = tpu.matmul %384, %386, %cst_105 {dimension_numbers = #tpu.dot_dimension_numbers<[1], [0], [0], [1], [0, 0, 1, 1], [], []>} : vector<8x8xf32>, vector<8x32xf32>, vector<8x32xf32> -> vector<8x32xf32>
    %388 = arith.addf %371, %387 : vector<8x32xf32>
    %cst_106 = arith.constant dense<0.000000e+00> : vector<8x16xf32>
    %389 = tpu.matmul %320, %328, %cst_106 {dimension_numbers = #tpu.dot_dimension_numbers<[1], [1], [0], [0], [0, 0, 1, 0], [], []>} : vector<8x8xf32>, vector<16x8xf32>, vector<8x16xf32> -> vector<8x16xf32>
    %cst_107 = arith.constant 0.353553385 : f32
    %390 = vector.broadcast %cst_107 : f32 to vector<8x16xf32>
    %391 = arith.mulf %389, %390 : vector<8x16xf32>
    %cst_108 = arith.constant dense<0xFF800000> : vector<8xf32>
    %392 = vector.multi_reduction <maximumf>, %391, %cst_108 [1] : vector<8x16xf32> to vector<8xf32>
    %393 = vector.shape_cast %392 : vector<8xf32> to vector<8x1xf32>
    %394 = vector.broadcast %393 : vector<8x1xf32> to vector<8x16xf32>
    %395 = arith.subf %391, %394 : vector<8x16xf32>
    %396 = math.exp %395 : vector<8x16xf32>
    %cst_109 = arith.constant dense<0.000000e+00> : vector<8xf32>
    %397 = vector.multi_reduction <add>, %396, %cst_109 [1] : vector<8x16xf32> to vector<8xf32>
    %398 = vector.shape_cast %397 : vector<8xf32> to vector<8x1xf32>
    %399 = vector.broadcast %398 : vector<8x1xf32> to vector<8x16xf32>
    %400 = arith.divf %396, %399 : vector<8x16xf32>
    %cst_110 = arith.constant dense<0.000000e+00> : vector<8x8xf32>
    %401 = tpu.matmul %400, %336, %cst_110 {dimension_numbers = #tpu.dot_dimension_numbers<[1], [0], [0], [1], [0, 0, 1, 1], [], []>} : vector<8x16xf32>, vector<16x8xf32>, vector<8x8xf32> -> vector<8x8xf32>
    %402 = vector.extract_strided_slice %12 {offsets = [7, 0, 0], sizes = [1, 8, 32], strides = [1, 1, 1]} : vector<8x8x32xf32> to vector<1x8x32xf32>
    %403 = vector.shape_cast %402 : vector<1x8x32xf32> to vector<8x32xf32>
    %cst_111 = arith.constant dense<0.000000e+00> : vector<8x32xf32>
    %404 = tpu.matmul %401, %403, %cst_111 {dimension_numbers = #tpu.dot_dimension_numbers<[1], [0], [0], [1], [0, 0, 1, 1], [], []>} : vector<8x8xf32>, vector<8x32xf32>, vector<8x32xf32> -> vector<8x32xf32>
    %405 = arith.addf %388, %404 : vector<8x32xf32>
    %406 = vector.extract_strided_slice %13 {offsets = [1, 0], sizes = [1, 32], strides = [1, 1]} : vector<2x32xf32> to vector<1x32xf32>
    %407 = vector.shape_cast %406 : vector<1x32xf32> to vector<32xf32>
    %408 = vector.shape_cast %407 : vector<32xf32> to vector<1x32xf32>
    %409 = vector.broadcast %408 : vector<1x32xf32> to vector<8x32xf32>
    %410 = arith.addf %405, %409 : vector<8x32xf32>
    %411 = arith.addf %240, %410 : vector<8x32xf32>
    %412 = vector.extract_strided_slice %4 {offsets = [2, 0], sizes = [1, 32], strides = [1, 1]} : vector<3x32xf32> to vector<1x32xf32>
    %413 = vector.shape_cast %412 : vector<1x32xf32> to vector<32xf32>
    %414 = vector.extract_strided_slice %5 {offsets = [2, 0], sizes = [1, 32], strides = [1, 1]} : vector<3x32xf32> to vector<1x32xf32>
    %415 = vector.shape_cast %414 : vector<1x32xf32> to vector<32xf32>
    %cst_112 = arith.constant dense<0.000000e+00> : vector<8xf32>
    %416 = vector.multi_reduction <add>, %411, %cst_112 [1] : vector<8x32xf32> to vector<8xf32>
    %417 = vector.shape_cast %416 : vector<8xf32> to vector<8x1xf32>
    %cst_113 = arith.constant 3.200000e+01 : f32
    %418 = vector.broadcast %cst_113 : f32 to vector<8x1xf32>
    %419 = arith.divf %417, %418 : vector<8x1xf32>
    %420 = vector.broadcast %419 : vector<8x1xf32> to vector<8x32xf32>
    %421 = arith.subf %411, %420 : vector<8x32xf32>
    %422 = arith.mulf %421, %421 : vector<8x32xf32>
    %cst_114 = arith.constant dense<0.000000e+00> : vector<8xf32>
    %423 = vector.multi_reduction <add>, %422, %cst_114 [1] : vector<8x32xf32> to vector<8xf32>
    %424 = vector.shape_cast %423 : vector<8xf32> to vector<8x1xf32>
    %cst_115 = arith.constant 3.200000e+01 : f32
    %425 = vector.broadcast %cst_115 : f32 to vector<8x1xf32>
    %426 = arith.divf %424, %425 : vector<8x1xf32>
    %427 = vector.broadcast %419 : vector<8x1xf32> to vector<8x32xf32>
    %428 = arith.subf %411, %427 : vector<8x32xf32>
    %cst_116 = arith.constant 9.99999974E-6 : f32
    %429 = vector.broadcast %cst_116 : f32 to vector<8x1xf32>
    %430 = arith.addf %426, %429 : vector<8x1xf32>
    %431 = math.rsqrt %430 : vector<8x1xf32>
    %432 = vector.broadcast %431 : vector<8x1xf32> to vector<8x32xf32>
    %433 = arith.mulf %428, %432 : vector<8x32xf32>
    %434 = vector.shape_cast %413 : vector<32xf32> to vector<1x32xf32>
    %435 = vector.broadcast %434 : vector<1x32xf32> to vector<8x32xf32>
    %436 = arith.mulf %433, %435 : vector<8x32xf32>
    %437 = vector.shape_cast %415 : vector<32xf32> to vector<1x32xf32>
    %438 = vector.broadcast %437 : vector<1x32xf32> to vector<8x32xf32>
    %439 = arith.addf %436, %438 : vector<8x32xf32>
    %c0_117 = arith.constant 0 : index
    %c0_118 = arith.constant 0 : index
    %440 = vector.load %arg13[%c0_117, %c0_118] : memref<32x128xf32, #tpu.memory_space<vmem>>, vector<32x128xf32>
    %cst_119 = arith.constant dense<0.000000e+00> : vector<8x128xf32>
    %441 = tpu.matmul %439, %440, %cst_119 {dimension_numbers = #tpu.dot_dimension_numbers<[1], [0], [0], [1], [0, 0, 1, 1], [], []>} : vector<8x32xf32>, vector<32x128xf32>, vector<8x128xf32> -> vector<8x128xf32>
    %c0_120 = arith.constant 0 : index
    %c0_121 = arith.constant 0 : index
    %442 = vector.load %arg14[%c0_120, %c0_121] : memref<1x128xf32, #tpu.memory_space<vmem>>, vector<1x128xf32>
    %443 = vector.broadcast %442 : vector<1x128xf32> to vector<8x128xf32>
    %444 = arith.addf %441, %443 : vector<8x128xf32>
    %cst_122 = arith.constant 5.000000e-01 : f32
    %445 = vector.broadcast %cst_122 : f32 to vector<8x128xf32>
    %446 = arith.mulf %445, %444 : vector<8x128xf32>
    %cst_123 = arith.constant 1.41421354 : f32
    %447 = vector.broadcast %cst_123 : f32 to vector<8x128xf32>
    %448 = arith.divf %444, %447 : vector<8x128xf32>
    %449 = math.erf %448 : vector<8x128xf32>
    %cst_124 = arith.constant 1.000000e+00 : f32
    %450 = vector.broadcast %cst_124 : f32 to vector<8x128xf32>
    %451 = arith.addf %450, %449 : vector<8x128xf32>
    %452 = arith.mulf %446, %451 : vector<8x128xf32>
    %c0_125 = arith.constant 0 : index
    %c0_126 = arith.constant 0 : index
    %453 = vector.load %arg15[%c0_125, %c0_126] : memref<128x32xf32, #tpu.memory_space<vmem>>, vector<128x32xf32>
    %cst_127 = arith.constant dense<0.000000e+00> : vector<8x32xf32>
    %454 = tpu.matmul %452, %453, %cst_127 {dimension_numbers = #tpu.dot_dimension_numbers<[1], [0], [0], [1], [0, 0, 1, 1], [], []>} : vector<8x128xf32>, vector<128x32xf32>, vector<8x32xf32> -> vector<8x32xf32>
    %c0_128 = arith.constant 0 : index
    %c0_129 = arith.constant 0 : index
    %455 = vector.load %arg16[%c0_128, %c0_129] : memref<1x32xf32, #tpu.memory_space<vmem>>, vector<1x32xf32>
    %456 = vector.broadcast %455 : vector<1x32xf32> to vector<8x32xf32>
    %457 = arith.addf %454, %456 : vector<8x32xf32>
    %458 = arith.addf %439, %457 : vector<8x32xf32>
    %459 = vector.shape_cast %458 : vector<8x32xf32> to vector<1x8x32xf32>
    %c0_130 = arith.constant 0 : index
    %c0_131 = arith.constant 0 : index
    %c0_132 = arith.constant 0 : index
    %460 = vector.load %arg17[%c0_130, %c0_131, %c0_132] : memref<1x8x32xf32, #tpu.memory_space<vmem>>, vector<1x8x32xf32>
    tpu.vector_store %arg17[%c0_130, %c0_131, %c0_132], %459 {strides = array<i32>} : memref<1x8x32xf32, #tpu.memory_space<vmem>>, vector<1x8x32xf32>,
    return
  }
  func.func @transform_0(%arg0: i32) -> (i32, i32, i32) {
    %c0_i32 = arith.constant 0 : i32
    %c0_i32_0 = arith.constant 0 : i32
    %c0_i32_1 = arith.constant 0 : i32
    return %arg0, %c0_i32, %c0_i32_0 : i32, i32, i32
  }
  func.func @transform_1(%arg0: i32) -> (i32, i32, i32) {
    %c0_i32 = arith.constant 0 : i32
    %c0_i32_0 = arith.constant 0 : i32
    %c0_i32_1 = arith.constant 0 : i32
    return %arg0, %c0_i32, %c0_i32_0 : i32, i32, i32
  }
  func.func @transform_2(%arg0: i32) -> (i32, i32) {
    %c0_i32 = arith.constant 0 : i32
    %c0_i32_0 = arith.constant 0 : i32
    %c0_i32_1 = arith.constant 0 : i32
    return %c0_i32, %c0_i32_0 : i32, i32
  }
  func.func @transform_3(%arg0: i32) -> (i32, i32) {
    %c0_i32 = arith.constant 0 : i32
    %c0_i32_0 = arith.constant 0 : i32
    %c0_i32_1 = arith.constant 0 : i32
    return %c0_i32, %c0_i32_0 : i32, i32
  }
  func.func @transform_4(%arg0: i32) -> (i32, i32, i32) {
    %c0_i32 = arith.constant 0 : i32
    %c0_i32_0 = arith.constant 0 : i32
    %c0_i32_1 = arith.constant 0 : i32
    %c0_i32_2 = arith.constant 0 : i32
    return %c0_i32, %c0_i32_0, %c0_i32_1 : i32, i32, i32
  }
  func.func @transform_5(%arg0: i32) -> (i32, i32) {
    %c0_i32 = arith.constant 0 : i32
    %c0_i32_0 = arith.constant 0 : i32
    %c0_i32_1 = arith.constant 0 : i32
    return %c0_i32, %c0_i32_0 : i32, i32
  }
  func.func @transform_6(%arg0: i32) -> (i32, i32, i32) {
    %c0_i32 = arith.constant 0 : i32
    %c0_i32_0 = arith.constant 0 : i32
    %c0_i32_1 = arith.constant 0 : i32
    %c0_i32_2 = arith.constant 0 : i32
    return %c0_i32, %c0_i32_0, %c0_i32_1 : i32, i32, i32
  }
  func.func @transform_7(%arg0: i32) -> (i32, i32) {
    %c0_i32 = arith.constant 0 : i32
    %c0_i32_0 = arith.constant 0 : i32
    %c0_i32_1 = arith.constant 0 : i32
    return %c0_i32, %c0_i32_0 : i32, i32
  }
  func.func @transform_8(%arg0: i32) -> (i32, i32, i32) {
    %c0_i32 = arith.constant 0 : i32
    %c0_i32_0 = arith.constant 0 : i32
    %c0_i32_1 = arith.constant 0 : i32
    %c0_i32_2 = arith.constant 0 : i32
    return %c0_i32, %c0_i32_0, %c0_i32_1 : i32, i32, i32
  }
  func.func @transform_9(%arg0: i32) -> (i32, i32) {
    %c0_i32 = arith.constant 0 : i32
    %c0_i32_0 = arith.constant 0 : i32
    %c0_i32_1 = arith.constant 0 : i32
    return %c0_i32, %c0_i32_0 : i32, i32
  }
  func.func @transform_10(%arg0: i32) -> (i32, i32, i32) {
    %c0_i32 = arith.constant 0 : i32
    %c0_i32_0 = arith.constant 0 : i32
    %c0_i32_1 = arith.constant 0 : i32
    %c0_i32_2 = arith.constant 0 : i32
    return %c0_i32, %c0_i32_0, %c0_i32_1 : i32, i32, i32
  }
  func.func @transform_11(%arg0: i32) -> (i32, i32) {
    %c0_i32 = arith.constant 0 : i32
    %c0_i32_0 = arith.constant 0 : i32
    %c0_i32_1 = arith.constant 0 : i32
    return %c0_i32, %c0_i32_0 : i32, i32
  }
  func.func @transform_12(%arg0: i32) -> (i32, i32) {
    %c0_i32 = arith.constant 0 : i32
    %c0_i32_0 = arith.constant 0 : i32
    %c0_i32_1 = arith.constant 0 : i32
    return %c0_i32, %c0_i32_0 : i32, i32
  }
  func.func @transform_13(%arg0: i32) -> (i32, i32) {
    %c0_i32 = arith.constant 0 : i32
    %c0_i32_0 = arith.constant 0 : i32
    %c0_i32_1 = arith.constant 0 : i32
    return %c0_i32, %c0_i32_0 : i32, i32
  }
  func.func @transform_14(%arg0: i32) -> (i32, i32) {
    %c0_i32 = arith.constant 0 : i32
    %c0_i32_0 = arith.constant 0 : i32
    %c0_i32_1 = arith.constant 0 : i32
    return %c0_i32, %c0_i32_0 : i32, i32
  }
  func.func @transform_15(%arg0: i32) -> (i32, i32) {
    %c0_i32 = arith.constant 0 : i32
    %c0_i32_0 = arith.constant 0 : i32
    %c0_i32_1 = arith.constant 0 : i32
    return %c0_i32, %c0_i32_0 : i32, i32
  }
  func.func @transform_16(%arg0: i32) -> (i32, i32, i32) {
    %c0_i32 = arith.constant 0 : i32
    %c0_i32_0 = arith.constant 0 : i32
    %c0_i32_1 = arith.constant 0 : i32
    return %arg0, %c0_i32, %c0_i32_0 : i32, i32, i32
  }
}

</mosaic_0001>

<bundles_post_ra>
// kernel: tpu_custom_call.1
= control target key start
LH: loop header
LB: loop body
LE: loop exit
PB: predicated region body
PF: predicated region fallthrough
CT: control target
= control target key end

     0   :  { %s6850_s0 = inlined_call_operand.vmem [shape: f32[2,8,32], index: 0, kind: input, shape index: {}]   ;;  %s6851_s1 = inlined_call_operand.vmem [shape: f32[2,16,32], index: 1, kind: input, shape index: {}]   ;;  %s6852_s2 = inlined_call_operand.vmem [shape: f32[3,32], index: 2, kind: input, shape index: {}]   ;;  %s6853_s3 = inlined_call_operand.vmem [shape: f32[3,32], index: 3, kind: input, shape index: {}]   ;;  %s6854_s4 = inlined_call_operand.vmem [shape: f32[8,32,8], index: 4, kind: input, shape index: {}]   ;;  %s6855_s5 = inlined_call_operand.vmem [shape: f32[8,8], index: 5, kind: input, shape index: {}]   ;;  %s6856_s6 = inlined_call_operand.vmem [shape: f32[8,32,8], index: 6, kind: input, shape index: {}]   ;;  %s6857_s7 = inlined_call_operand.vmem [shape: f32[8,8], index: 7, kind: input, shape index: {}]   ;;  %s6858_s8 = inlined_call_operand.vmem [shape: f32[8,32,8], index: 8, kind: input, shape index: {}]   ;;  %s6859_s9 = inlined_call_operand.vmem [shape: f32[8,8], index: 9, kind: input, shape index: {}]   ;;  %s6860_s10 = inlined_call_operand.vmem [shape: f32[8,8,32], index: 10, kind: input, shape index: {}]   ;;  %s6861_s11 = inlined_call_operand.vmem [shape: f32[2,32], index: 11, kind: input, shape index: {}]   ;;  %s6862_s12 = inlined_call_operand.vmem [shape: f32[32,128], index: 12, kind: input, shape index: {}]   ;;  %s6863_s13 = inlined_call_operand.vmem [shape: f32[1,128], index: 13, kind: input, shape index: {}]   ;;  %s6864_s14 = inlined_call_operand.vmem [shape: f32[128,32], index: 14, kind: input, shape index: {}]   ;;  %s6865_s15 = inlined_call_operand.vmem [shape: f32[1,32], index: 15, kind: input, shape index: {}]   ;;  %s6866_s16 = inlined_call_operand.hbm [shape: f32[2,8,32], index: 16, kind: output, shape index: {}]  }
   0x1   :  { %6871 = sst [smem:[#allocation9_spill]] %s6850_s0 }
   0x2   :  { %6872 = sst [smem:[#allocation10_spill]] %s6851_s1 }
   0x3   :  { %21 = vsyncpa [#allocation3], 0 }
   0x4   :  { %23 = vsyncpa [#allocation3 + $0x1], 0  ;;  %s5912_s21 = smov 0   ;;  %s5914_s22 = smov 0  }
   0x5   :  { %s5916_s23 = smov 0   ;;  %s5918_s24 = smov 0  }
   0x6 LB: > { %6873 = sst [smem:[#allocation5_spill]] %s5817_s23  ;;  %s5933_s25 = sadd.s32 4294967295, %s5821_s24   ;;  %s5821_s24 = sphi %s5918_s24, %s6884_s24   ;;  %s5817_s23 = sphi %s5916_s23, %s6886_s23   ;;  %s5813_s22 = sphi %s5914_s22, %s6888_s22   ;;  %s5809_s21 = sphi %s5912_s21, %s6887_s21  }
   0x7   : > { %s4721_s26 = sadd.s32 4294967294, %s5821_s24   ;;  %s5937_s27 = sadd.s32 1, %s5821_s24  }
   0x8   : > { %6874 = sst [smem:[#allocation6_spill]] %s5937_s27  ;;  %s382_s28 = sadd.s32 1, %s5817_s23 }
   0x9   : > { %s379_s29 = ssub.s32 %s5821_s24, %s5937_s27  ;;  %p392_p0 = scmp.ne.s32.totalorder %s5817_s23, %s5813_s22 }
   0xa   : > { %p380_p1 = scmp.eq.s32.totalorder %s379_s29, 0  ;;  %p393_p2 = scmp.eq.s32.totalorder %s5933_s25, 1 }
   0xb   : > { %p398_p3 = scmp.ne.s32.totalorder %s5813_s22, %s5809_s21  ;;  %p399_p4 = scmp.eq.s32.totalorder %s4721_s26, 1 }
   0xc   : > { %s5948_s30 = scalar_select %p380_p1, %s5817_s23, %s382_s28  }
   0xd   : > { %p5950_p5 = por %p393_p2, %p392_p0  ;;  %p5954_p6 = por %p399_p4, %p398_p3 }
   0xe   : > { %6875 = sst [smem:[#allocation7_spill]] %s5948_s30  ;;  %p4724_p7 = scmp.ge.s32.totalorder %s5821_s24, 1 }
   0xf   : > { %s6877_s17 = scalar_select %p5954_p6, 1, 0 }
  0x10   : > { %p474_p8 = scmp.lt.s32.totalorder %s5821_s24, 3 }
  0x11   : > { %6878 = sst [smem:[#allocation8_spill]] %s6877_s17 }
  0x12   : > { %p475_p9 = pnand %p4724_p7, %p474_p8 }
  0x13   : > { %p528_p10 = scmp.lt.s32.totalorder (!%p475_p9), %s5933_s25, 1  ;;  %vm650_vm0 = vcmask (!%p475_p9), 261120   ;;  %s6879_s28 = sld [smem:[#allocation9_spill]] (!%p475_p9)  ;;  %v542_v7 = vld [vmem:[%s6854_s4] sm:$0xff] (!%p475_p9)  ;;  %v543_v8 = vld [vmem:[%s6854_s4 + $0x8] sm:$0xff] (!%p475_p9)  ;;  %v5823_v12 = vmov (!%p475_p9), 0.0|0.0   ;;  %v665_v23 = vlaneseq (!%p475_p9) }
  0x14   : > { %478 = sbr.rel (%p475_p9) target bundleno = 7095 (0x1bb7), region = 84  ;;  %v546_v9 = vld [vmem:[%s6854_s4 + $0x20] sm:$0xff] (!%p475_p9)  ;;  %v5458_v10 = vpack.c.bf16 (!%p475_p9), %v543_v8, %v542_v7  ;;  %v547_v11 = vld [vmem:[%s6854_s4 + $0x28] sm:$0xff] (!%p475_p9)  ;;  %5457 = vmatprep.subr.bf16.mxu0 (!%p475_p9), %v5823_v12  ;;  %5475 = vmatprep.subr.bf16.mxu1 (!%p475_p9), %v5823_v12  ;;  %v544_v14 = vld [vmem:[%s6854_s4 + $0x10] sm:$0xff] (!%p475_p9)  ;;  %vm5824_vm1 = vmmov (!%p475_p9), 0   ;;  %v5825_v20 = vmov (!%p475_p9), 0.0  }
  0x15   : > { %v5476_v13 = vpack.c.bf16 (!%p475_p9), %v547_v11, %v546_v9  ;;  %v545_v15 = vld [vmem:[%s6854_s4 + $0x18] sm:$0xff] (!%p475_p9)  ;;  %v548_v16 = vld [vmem:[%s6854_s4 + $0x30] sm:$0xff] (!%p475_p9)  ;;  %5019 = vmatprep.mubr.msk.f32.mxu0 (!%p475_p9), %vm5824_vm1, %v5825_v20  ;;  %5052 = vmatprep.mubr.msk.f32.mxu1 (!%p475_p9), %vm5824_vm1, %v5825_v20  ;;  %v6004_v25 = vshrl.u32 (!%p475_p9), %v665_v23, 7  ;;  %v6012_v27 = vld [vmem:[%s6852_s2] sm:$0x7] (!%p475_p9)  ;;  %vm1566_vm2 = vcmask (!%p475_p9), 64512  }
  0x16   : > { %5459 = vmatpush3.bf16.msra.mxu0 (!%p475_p9), %v5458_v10  ;;  %v5461_v17 = vpack.c.bf16 (!%p475_p9), %v545_v15, %v544_v14  ;;  %v549_v18 = vld [vmem:[%s6854_s4 + $0x38] sm:$0xff] (!%p475_p9)  ;;  %v6017_v28 = vld [vmem:[%s6853_s3] sm:$0x7] (!%p475_p9)  ;;  %v576_v34 = vld [vmem:[%s6856_s6 + $0x8] sm:$0xff] (!%p475_p9)  ;;  %s6880_s1 = sld [smem:[#allocation10_spill]] (!%p475_p9)  ;;  %vm3551_vm4 = vcmask (!%p475_p9), 130048  }
  0x17   : > { %5477 = vmatpush3.bf16.msra.mxu1 (!%p475_p9), %v5476_v13  ;;  %5460 = vmatprep.subr.bf16.mxu0 (!%p475_p9), %v5823_v12  ;;  %v5479_v19 = vpack.c.bf16 (!%p475_p9), %v549_v18, %v548_v16  ;;  %v6007_v26 = vsub.s32 (!%p475_p9), 0, %v6004_v25  ;;  %v575_v31 = vld [vmem:[%s6856_s6] sm:$0xff] (!%p475_p9)  ;;  %v613_v36 = vld [vmem:[%s6858_s8 + $0x28] sm:$0xff] (!%p475_p9)  ;;  %v577_v40 = vld [vmem:[%s6856_s6 + $0x10] sm:$0xff] (!%p475_p9) }
  0x18   : > { %5478 = vmatprep.subr.bf16.mxu1 (!%p475_p9), %v5823_v12  ;;  %v612_v35 = vld [vmem:[%s6858_s8 + $0x20] sm:$0xff] (!%p475_p9)  ;;  %v5464_v38 = vpack.c.bf16 (!%p475_p9), %v576_v34, %v575_v31  ;;  %v578_v42 = vld [vmem:[%s6856_s6 + $0x18] sm:$0xff] (!%p475_p9)  ;;  %v614_v43 = vld [vmem:[%s6858_s8 + $0x30] sm:$0xff] (!%p475_p9) }
  0x19   : > { %v668_v29 = vrot.slane (!%p475_p9), %v6012_v27, %v6007_v26  ;;  %v673_v32 = vrot.slane (!%p475_p9), %v6017_v28, %v6007_v26  ;;  %v5488_v39 = vpack.c.bf16 (!%p475_p9), %v613_v36, %v612_v35  ;;  %v615_v44 = vld [vmem:[%s6858_s8 + $0x38] sm:$0xff] (!%p475_p9)  ;;  %v5467_v45 = vpack.c.bf16 (!%p475_p9), %v578_v42, %v577_v40  ;;  %v608_v47 = vld [vmem:[%s6858_s8] sm:$0xff] (!%p475_p9)  ;;  %v609_v48 = vld [vmem:[%s6858_s8 + $0x8] sm:$0xff] (!%p475_p9) }
  0x1a   : > { %5462 = vmatpush3.bf16.msra.mxu0 (!%p475_p9), %v5461_v17  ;;  %v5491_v46 = vpack.c.bf16 (!%p475_p9), %v615_v44, %v614_v43  ;;  %v583_v49 = vld [vmem:[%s6856_s6 + $0x40] sm:$0xff] (!%p475_p9)  ;;  %v584_v50 = vld [vmem:[%s6856_s6 + $0x48] sm:$0xff] (!%p475_p9)  ;;  %v5470_v51 = vpack.c.bf16 (!%p475_p9), %v609_v48, %v608_v47  ;;  %v610_v53 = vld [vmem:[%s6858_s8 + $0x10] sm:$0xff] (!%p475_p9)  ;;  %v6226_v44 = vsub.s32 (!%p475_p9), 1, %v6004_v25 }
  0x1b   : > { %s5962_s18 = scalar_select %p528_p10, %s5933_s25, 1  ;;  %5480 = vmatpush3.bf16.msra.mxu1 %v5479_v19  ;;  %5463 = vmatprep.subr.bf16.mxu0 %v5823_v12  ;;  %v5500_v52 = vpack.c.bf16 %v584_v50, %v583_v49  ;;  %v611_v54 = vld [vmem:[%s6858_s8 + $0x18] sm:$0xff]  ;;  %v585_v55 = vld [vmem:[%s6856_s6 + $0x50] sm:$0xff]  ;;  %v579_v59 = vld [vmem:[%s6856_s6 + $0x20] sm:$0xff] }
  0x1c   : > { %5487 = vmatprep.subr.bf16.mxu1 %v5823_v12  ;;  %v586_v56 = vld [vmem:[%s6856_s6 + $0x58] sm:$0xff]  ;;  %v5473_v57 = vpack.c.bf16 %v611_v54, %v610_v53  ;;  %v580_v60 = vld [vmem:[%s6856_s6 + $0x28] sm:$0xff]  ;;  %v554_v61 = vld [vmem:[%s6854_s4 + $0x60] sm:$0xff] }
  0x1d   : > { %s4726_s19 = sshll.u32 %s5962_s18, 3  ;;  %v5503_v58 = vpack.c.bf16 %v586_v56, %v585_v55  ;;  %v555_v62 = vld [vmem:[%s6854_s4 + $0x68] sm:$0xff]  ;;  %v5482_v63 = vpack.c.bf16 %v580_v60, %v579_v59  ;;  %v550_v7 = vld [vmem:[%s6854_s4 + $0x40] sm:$0xff]  ;;  %v552_v14 = vld [vmem:[%s6854_s4 + $0x50] sm:$0xff]  ;;  %s4804_s26 = sshll.u32 %s5962_s18, 4 }
  0x1e   : > { %s531_s29 = scalar_lea.vmem %s6879_s28, %s4726_s19  ;;  %v551_v8 = vld [vmem:[%s6854_s4 + $0x48] sm:$0xff]  ;;  %v620_v9 = vld [vmem:[%s6858_s8 + $0x60] sm:$0xff]  ;;  %v553_v15 = vld [vmem:[%s6854_s4 + $0x58] sm:$0xff]  ;;  %s536_s27 = scalar_lea.vmem %s6880_s1, %s4804_s26 }
  0x1f   : > { %v537_v0 = vld [vmem:[%s531_s29] sm:$0xff]  ;;  %v621_v10 = vld [vmem:[%s6858_s8 + $0x68] sm:$0xff]  ;;  %v5494_v11 = vpack.c.bf16 %v551_v8, %v550_v7  ;;  %v622_v16 = vld [vmem:[%s6858_s8 + $0x70] sm:$0xff]  ;;  %v5497_v18 = vpack.c.bf16 %v553_v15, %v552_v14  ;;  %s525_s29 = sand.u32 1, %s5813_s22  }
  0x20   : > { %v651_v1 = vsel %vm650_vm0, %v537_v0, 0.0  ;;  %v5524_v13 = vpack.c.bf16 %v621_v10, %v620_v9  ;;  %v623_v17 = vld [vmem:[%s6858_s8 + $0x78] sm:$0xff]  ;;  %v587_v31 = vld [vmem:[%s6856_s6 + $0x60] sm:$0xff]  ;;  %v589_v34 = vld [vmem:[%s6856_s6 + $0x70] sm:$0xff]  ;;  %s4725_s19 = sshll.u32 %s525_s29, 3  ;;  %s4637_s20 = scalar_lea.sflag [#allocation3], %s525_s29 }
  0x21   : > { %652 = vadd.xlane.f32.xlu0 %v651_v1  ;;  %v581_v1 = vld [vmem:[%s6856_s6 + $0x30] sm:$0xff]  ;;  %v5527_v19 = vpack.c.bf16 %v623_v17, %v622_v16  ;;  %v590_v35 = vld [vmem:[%s6856_s6 + $0x78] sm:$0xff]  ;;  %v6218_v42 = vld [vmem:[%s6857_s7] sm:$0xff]  ;;  %s527_s28 = scalar_lea.vmem [#allocation2], %s4725_s19 }
  0x22   : > { %v5521_v36 = vpack.c.bf16 %v590_v35, %v589_v34  ;;  %v6223_v43 = vld [vmem:[%s6859_s9] sm:$0xff]  ;;  %vm6562_vm3 = vmpackc.low %vm1566_vm2, %vm1566_vm2  ;;  %s4650_s23 = sshll.u32 %s527_s28, 4  ;;  %s6809_s23 = int_to_ptr.vmem [resolvable:$true] %s4650_s23 }
  0x23   : > { %v1051_v47 = vrot.slane %v6223_v43, %v6226_v44  ;;  %v829_v56 = vrot.slane %v6223_v43, %v6007_v26  ;;  %s5759_s26 = scalar_lea.vmem %s6809_s23, 128 }
  0x24   : > { %p5760_p11 = scmp.ne.s32.totalorder %s6809_s23, %s5759_s26 }
  0x26   : > { %p5761_p12 = pnand %p5760_p11, %p5950_p5 }
  0x28   : > { %p5762_p13 = pneg %p5761_p12 }
  0xae   : > { %v653_v2 = vpop.xlane.xlu0 %652 }
  0xaf   : > { %v655_v3 = vmul.f32 0.03125, %v653_v2  ;;  %v582_v2 = vld [vmem:[%s6856_s6 + $0x38] sm:$0xff] }
  0xb1   : > { %v656_v4 = vsub.f32 %v537_v0, %v655_v3  ;;  %v5512_v0 = vpack.c.bf16 %v555_v62, %v554_v61  ;;  %v556_v3 = vld [vmem:[%s6854_s4 + $0x70] sm:$0xff] }
  0xb3   : > { %v657_v5 = vmul.f32 %v656_v4, %v656_v4 }
  0xb5   : > { %v658_v6 = vsel %vm650_vm0, %v657_v5, 0.0  ;;  %v5485_v5 = vpack.c.bf16 %v582_v2, %v581_v1  ;;  %v6253_v2 = vsub.s32 3, %v6004_v25 }
  0xb6   : > { %659 = vadd.xlane.f32.xlu0 %v658_v6 }
 0x143   : > { %v660_v21 = vpop.xlane.xlu0 %659 }
 0x144   : > { %v661_v22 = vmul.f32 0.03125, %v660_v21  ;;  %v616_v21 = vld [vmem:[%s6858_s8 + $0x40] sm:$0xff] }
 0x146   : > { %v662_v24 = vadd.f32 1e-05, %v661_v22  ;;  %v617_v22 = vld [vmem:[%s6858_s8 + $0x48] sm:$0xff] }
 0x147   : > { %v5506_v23 = vpack.c.bf16 %v617_v22, %v616_v21 }
 0x148   : > { %5717 = vrsqrt.f32 %v662_v24  ;;  %v618_v24 = vld [vmem:[%s6858_s8 + $0x50] sm:$0xff] }
 0x152   : > { %v5718_v30 = vpop.eup %5717 }
 0x153   : > { %v664_v33 = vmul.f32 %v5718_v30, %v656_v4  ;;  %v557_v4 = vld [vmem:[%s6854_s4 + $0x78] sm:$0xff] }
 0x154   : > { %v5515_v6 = vpack.c.bf16 %v557_v4, %v556_v3  ;;  %v1495_v3 = vrot.slane %v6223_v43, %v6253_v2 }
 0x155   : > { %v669_v37 = vmul.f32 %v668_v29, %v664_v33  ;;  %v619_v29 = vld [vmem:[%s6858_s8 + $0x58] sm:$0xff] }
 0x156   : > { %v5509_v30 = vpack.c.bf16 %v619_v29, %v618_v24  ;;  %v977_v29 = vrot.slane %v6218_v42, %v6226_v44 }
 0x157   : > { %v6038_v41 = vadd.f32 %v673_v32, %v669_v37  ;;  %v588_v32 = vld [vmem:[%s6856_s6 + $0x68] sm:$0xff] }
 0x158   : > { %v5518_v33 = vpack.c.bf16 %v588_v32, %v587_v31 }
 0x159   : > { %5020 = vmatmul.mubr.msk.f32.vlgmr.msra.gmra.mrb[0].mxu0 %vm650_vm0, %v6038_v41  ;;  %5053 = vmatmul.mubr.msk.f32.vlgmr.msra.gmra.mrb[0].mxu1 %vm650_vm0, %v6038_v41 }
 0x15a   : > { %5465 = vmatpush3.bf16.msra.mxu0 %v5464_v38  ;;  %5489 = vmatpush3.bf16.msra.mxu1 %v5488_v39 }
 0x15b   : > { %5466 = vmatprep.subr.bf16.mxu0 %v5823_v12  ;;  %5490 = vmatprep.subr.bf16.mxu1 %v5823_v12 }
 0x15c   : > { %5030 = vmatprep.mubr.msk.f32.mxu0 %vm5824_vm1, %v5825_v20  ;;  %5074 = vmatprep.mubr.msk.f32.mxu1 %vm5824_vm1, %v5825_v20 }
 0x15e   : > { %5468 = vmatpush3.bf16.msra.mxu0 %v5467_v45  ;;  %5492 = vmatpush3.bf16.msra.mxu1 %v5491_v46  ;;  %v6231_v45 = vld [vmem:[%s6855_s5] sm:$0xff]  ;;  %v755_v46 = vrot.slane %v6218_v42, %v6007_v26 }
 0x15f   : > { %5469 = vmatprep.subr.bf16.mxu0 %v5823_v12  ;;  %5499 = vmatprep.subr.bf16.mxu1 %v5823_v12  ;;  %v678_v48 = vrot.slane %v6231_v45, %v6007_v26  ;;  %v903_v31 = vrot.slane %v6231_v45, %v6226_v44 }
 0x161   : > { %5031 = vmatmul.mubr.msk.f32.vlgmr.msra.gmra.mrb[2].mxu0 %vm650_vm0, %v6038_v41  ;;  %5075 = vmatmul.mubr.msk.f32.vlgmr.msra.gmra.mrb[2].mxu1 %vm650_vm0, %v6038_v41 }
 0x162   : > { %5471 = vmatpush3.bf16.msra.mxu0 %v5470_v51  ;;  %5501 = vmatpush3.bf16.msra.mxu1 %v5500_v52 }
 0x163   : > { %5472 = vmatprep.subr.bf16.mxu0 %v5823_v12  ;;  %5502 = vmatprep.subr.bf16.mxu1 %v5823_v12 }
 0x164   : > { %5041 = vmatprep.mubr.msk.f32.mxu0 %vm5824_vm1, %v5825_v20  ;;  %5096 = vmatprep.mubr.msk.f32.mxu1 %vm5824_vm1, %v5825_v20 }
 0x166   : > { %5474 = vmatpush3.bf16.msra.mxu0 %v5473_v57  ;;  %5504 = vmatpush3.bf16.msra.mxu1 %v5503_v58 }
 0x167   : > { %5481 = vmatprep.subr.bf16.mxu0 %v5823_v12  ;;  %5511 = vmatprep.subr.bf16.mxu1 %v5823_v12 }
 0x169   : > { %5042 = vmatmul.mubr.msk.f32.vlgmr.msra.gmra.mrb[4].mxu0 %vm650_vm0, %v6038_v41  ;;  %5097 = vmatmul.mubr.msk.f32.vlgmr.msra.gmra.mrb[4].mxu1 %vm650_vm0, %v6038_v41 }
 0x16a   : > { %5483 = vmatpush3.bf16.msra.mxu0 %v5482_v63  ;;  %5513 = vmatpush3.bf16.msra.mxu1 %v5512_v0 }
 0x16b   : > { %5484 = vmatprep.subr.bf16.mxu0 %v5823_v12  ;;  %5514 = vmatprep.subr.bf16.mxu1 %v5823_v12 }
 0x16c   : > { %5063 = vmatprep.mubr.msk.f32.mxu0 %vm5824_vm1, %v5825_v20  ;;  %5118 = vmatprep.mubr.msk.f32.mxu1 %vm5824_vm1, %v5825_v20 }
 0x16e   : > { %5486 = vmatpush3.bf16.msra.mxu0 %v5485_v5  ;;  %5516 = vmatpush3.bf16.msra.mxu1 %v5515_v6 }
 0x16f   : > { %5493 = vmatprep.subr.bf16.mxu0 %v5823_v12  ;;  %5523 = vmatprep.subr.bf16.mxu1 %v5823_v12 }
 0x171   : > { %5064 = vmatmul.mubr.msk.f32.vlgmr.msra.gmra.mrb[6].mxu0 %vm650_vm0, %v6038_v41  ;;  %5119 = vmatmul.mubr.msk.f32.vlgmr.msra.gmra.mrb[6].mxu1 %vm650_vm0, %v6038_v41 }
 0x172   : > { %5495 = vmatpush3.bf16.msra.mxu0 %v5494_v11  ;;  %5525 = vmatpush3.bf16.msra.mxu1 %v5524_v13 }
 0x173   : > { %5496 = vmatprep.subr.bf16.mxu0 %v5823_v12  ;;  %5526 = vmatprep.subr.bf16.mxu1 %v5823_v12 }
 0x174   : > { %5085 = vmatprep.mubr.msk.f32.mxu0 %vm5824_vm1, %v5825_v20  ;;  %5140 = vmatprep.mubr.msk.f32.mxu1 %vm5824_vm1, %v5825_v20 }
 0x176   : > { %5498 = vmatpush3.bf16.msra.mxu0 %v5497_v18  ;;  %5528 = vmatpush3.bf16.msra.mxu1 %v5527_v19 }
 0x177   : > { %5505 = vmatprep.subr.bf16.mxu0 %v5823_v12  ;;  %5158 = vmatprep.subr.mxu1 %v5825_v20 }
 0x179   : > { %5086 = vmatmul.mubr.msk.f32.vlgmr.msra.gmra.mrb[8].mxu0 %vm650_vm0, %v6038_v41  ;;  %5141 = vmatmul.mubr.msk.f32.vlgmr.msra.gmra.mrb[8].mxu1 %vm650_vm0, %v6038_v41 }
 0x17a   : > { %5507 = vmatpush3.bf16.msra.mxu0 %v5506_v23  ;;  %5107 = vmatprep.mubr.msk.f32.mxu0 %vm5824_vm1, %v5825_v20 }
 0x17b   : > { %5508 = vmatprep.subr.bf16.mxu0 %v5823_v12  ;;  %5160 = vmatprep.mubr.msk.f32.mxu1 %vm5824_vm1, %v5825_v20 }
 0x17e   : > { %5510 = vmatpush3.bf16.msra.mxu0 %v5509_v30 }
 0x17f   : > { %5517 = vmatprep.subr.bf16.mxu0 %v5823_v12 }
 0x181   : > { %5108 = vmatmul.mubr.msk.f32.vlgmr.msra.gmra.mrb[10].mxu0 %vm650_vm0, %v6038_v41 }
 0x182   : > { %5519 = vmatpush3.bf16.msra.mxu0 %v5518_v33  ;;  %5129 = vmatprep.mubr.msk.f32.mxu0 %vm5824_vm1, %v5825_v20 }
 0x183   : > { %5520 = vmatprep.subr.bf16.mxu0 %v5823_v12 }
 0x186   : > { %5522 = vmatpush3.bf16.msra.mxu0 %v5521_v36 }
 0x187   : > { %5143 = vmatprep.subr.mxu0 %v5825_v20 }
 0x189   : > { %5130 = vmatmul.mubr.msk.f32.vlgmr.msra.gmra.mrb[12].mxu0 %vm650_vm0, %v6038_v41 }
 0x18a   : > { %5145 = vmatprep.mubr.msk.f32.mxu0 %vm5824_vm1, %v5825_v20 }
 0x22c   : > { %v748_v37 = vpop.f32.mrb[0].mxu0  ;;  %v6213_v38 = vpop.f32.mrb[0].mxu1 }
 0x22d   : > { %v5021_v39 = vpop.f32.mrb[1].mxu0  ;;  %v5054_v40 = vpop.f32.mrb[1].mxu1  ;;  %v749_v55 = vadd.f32 %v748_v37, %v678_v48  ;;  %v971_v34 = vadd.f32 %v6213_v38, %v903_v31 }
 0x234   : > { %v822_v49 = vpop.f32.mrb[2].mxu0  ;;  %v1118_v50 = vpop.f32.mrb[2].mxu1 }
 0x235   : > { %v823_v51 = vadd.f32 %v822_v49, %v755_v46  ;;  %v1119_v52 = vadd.f32 %v1118_v50, %v1051_v47  ;;  %v5032_v53 = vpop.f32.mrb[3].mxu0  ;;  %v5076_v54 = vpop.f32.mrb[3].mxu1 }
 0x236   : > { %v6285_v54 = vsub.s32 2, %v6004_v25 }
 0x237   : > { %5144 = vmatpush3.xpose.msk.msra.mxu0 %vm1566_vm2, %v823_v51  ;;  %5159 = vmatpush3.msra.mxu1 %v1119_v52  ;;  %v642_v51 = vld [vmem:[%s6860_s10 + $0x8] sm:$0xff] }
 0x238   : > { %5148 = vmatprep.subr.mxu0 %v5825_v20  ;;  %5168 = vmatprep.subr.mxu1 %v5825_v20 }
 0x23a   : > { %5146 = vmatmul.mubr.msk.f32.vlgmr.msra.gmra.mrb[14].mxu0 %vm1566_vm2, %v749_v55 }
 0x23b   : > { %5150 = vmatprep.mubr.msk.f32.mxu0 %vm5824_vm1, %v5825_v20 }
 0x23c   : > { %v896_v57 = vpop.f32.mrb[4].mxu0  ;;  %v6247_v58 = vpop.f32.mrb[4].mxu1 }
 0x23d   : > { %v897_v59 = vadd.f32 %v896_v57, %v829_v56  ;;  %v5043_v60 = vpop.f32.mrb[5].mxu0  ;;  %v5098_v61 = vpop.f32.mrb[5].mxu1  ;;  %v641_v56 = vld [vmem:[%s6860_s10] sm:$0xff]  ;;  %v1273_v57 = vrot.slane %v6223_v43, %v6285_v54 }
 0x23e   : > { %v1199_v60 = vrot.slane %v6218_v42, %v6285_v54  ;;  %v1125_v61 = vrot.slane %v6231_v45, %v6285_v54 }
 0x23f   : > { %5149 = vmatpush3.msra.mxu0 %v897_v59 }
 0x240   : > { %5153 = vmatprep.subr.mxu0 %v5825_v20 }
 0x244   : > { %v1044_v62 = vpop.f32.mrb[6].mxu0  ;;  %v6250_v63 = vpop.f32.mrb[6].mxu1 }
 0x245   : > { %v5065_v0 = vpop.f32.mrb[7].mxu0  ;;  %v5120_v1 = vpop.f32.mrb[7].mxu1  ;;  %v1045_v33 = vadd.f32 %v1044_v62, %v977_v29  ;;  %v1267_v62 = vadd.f32 %v6247_v58, %v1199_v60  ;;  %v1347_v29 = vrot.slane %v6231_v45, %v6253_v2 }
 0x24c   : > { %v6257_v4 = vpop.f32.mrb[8].mxu0  ;;  %v1562_v5 = vpop.f32.mrb[8].mxu1 }
 0x24d   : > { %v6259_v6 = vadd.f32 %v1562_v5, %v1495_v3  ;;  %v5087_v7 = vpop.f32.mrb[9].mxu0  ;;  %v5142_v8 = vpop.f32.mrb[9].mxu1  ;;  %v1193_v3 = vadd.f32 %v6257_v4, %v1125_v61 }
 0x254   : > { %v1340_v9 = vpop.f32.mrb[10].mxu0 }
 0x255   : > { %v5109_v10 = vpop.f32.mrb[11].mxu0  ;;  %v1341_v59 = vadd.f32 %v1340_v9, %v1273_v57 }
 0x25c   : > { %v6261_v11 = vpop.f32.mrb[12].mxu0 }
 0x25d   : > { %v5131_v13 = vpop.f32.mrb[13].mxu0 }
 0x30d   : > { %v1639_v14 = vpop.f32.mrb[14].mxu0 }
 0x30e   : > { %v1643_v15 = vmul.f32 0.35355338, %v1639_v14  ;;  %v5147_v16 = vpop.f32.mrb[15].mxu0 }
 0x310   : > { %v1644_v17 = vsel %vm1566_vm2, %v1643_v15, -inf }
 0x311   : > { %1645 = vmax.xlane.f32.xlu1 %v1644_v17 }
 0x39e   : > { %v1646_v18 = vpop.xlane.xlu1 %1645 }
 0x39f   : > { %v1647_v19 = vsub.f32 %v1643_v15, %v1646_v18 }
 0x3a1   : > { %v1648_v21 = vmul.f32 1.442695, %v1647_v19 }
 0x3a3   : > { %5719 = vpow2.f32 %v1648_v21  ;;  %v643_v21 = vld [vmem:[%s6860_s10 + $0x10] sm:$0xff] }
 0x3ad   : > { %v5720_v22 = vpop.eup %5719 }
 0x3ae   : > { %v1650_v23 = vsel %vm1566_vm2, %v5720_v22, 0.0 }
 0x3af   : > { %1651 = vadd.xlane.f32.xlu1 %v1650_v23  ;;  %v1421_v23 = vrot.slane %v6218_v42, %v6253_v2 }
 0x3b1   : > { %v1489_v31 = vadd.f32 %v6261_v11, %v1421_v23  ;;  %v561_v23 = vld [vmem:[%s6854_s4 + $0x98] sm:$0xff] }
 0x43c   : > { %v1652_v24 = vpop.xlane.xlu1 %1651 }
 0x43d   : > { %5721 = vrcp.f32 %v1652_v24 }
 0x447   : > { %v5722_v30 = vpop.eup %5721 }
 0x448   : > { %v1654_v32 = vmul.f32 %v5722_v30, %v5720_v22 }
 0x44a   : > { %5151 = vmatmul.mubr.msk.f32.vlgmr.msra.gmra.mrb[16].mxu0 %vm1566_vm2, %v1654_v32  ;;  %v1415_v32 = vadd.f32 %v6250_v63, %v1347_v29 }
 0x44b   : > { %5154 = vmatpush3.xpose.msk.msra.mxu0 %vm1566_vm2, %v1045_v33  ;;  %5155 = vmatprep.mubr.msk.f32.mxu0 %vm5824_vm1, %v5825_v20 }
 0x44c   : > { %5163 = vmatprep.subr.mxu0 %v5825_v20 }
 0x44e   : > { %5156 = vmatmul.mubr.msk.f32.vlgmr.msra.gmra.mrb[18].mxu0 %vm1566_vm2, %v971_v34 }
 0x44f   : > { %5165 = vmatprep.mubr.msk.f32.mxu0 %vm5824_vm1, %v5825_v20  ;;  %5164 = vmatpush3.msra.mxu0 %v642_v51 }
 0x450   : > { %5173 = vmatprep.subr.mxu0 %v5825_v20 }
 0x51d   : > { %v1724_v35 = vpop.f32.mrb[16].mxu0 }
 0x51e   : > { %v5152_v36 = vpop.f32.mrb[17].mxu0 }
 0x521   : > { %v1800_v37 = vpop.f32.mrb[18].mxu0 }
 0x522   : > { %v1804_v39 = vmul.f32 0.35355338, %v1800_v37  ;;  %v5157_v40 = vpop.f32.mrb[19].mxu0 }
 0x524   : > { %v1805_v46 = vsel %vm1566_vm2, %v1804_v39, -inf }
 0x525   : > { %1806 = vmax.xlane.f32.xlu0 %v1805_v46 }
 0x5b2   : > { %v1807_v47 = vpop.xlane.xlu0 %1806 }
 0x5b3   : > { %v1808_v48 = vsub.f32 %v1804_v39, %v1807_v47 }
 0x5b5   : > { %v1809_v49 = vmul.f32 1.442695, %v1808_v48 }
 0x5b7   : > { %5723 = vpow2.f32 %v1809_v49 }
 0x5c1   : > { %v5724_v38 = vpop.eup %5723 }
 0x5c2   : > { %v1811_v50 = vsel %vm1566_vm2, %v5724_v38, 0.0 }
 0x5c3   : > { %1812 = vadd.xlane.f32.xlu1 %v1811_v50 }
 0x650   : > { %v1813_v52 = vpop.xlane.xlu1 %1812 }
 0x651   : > { %5725 = vrcp.f32 %v1813_v52  ;;  %v6351_v52 = vld [vmem:[%s536_s27] sm:$0xff] }
 0x65b   : > { %v5726_v53 = vpop.eup %5725 }
 0x65c   : > { %v1815_v55 = vmul.f32 %v5726_v53, %v5724_v38 }
 0x65e   : > { %5161 = vmatmul.mubr.msk.f32.vlgmr.msra.gmra.mrb[10].mxu1 %vm1566_vm2, %v1815_v55 }
 0x65f   : > { %5169 = vmatpush3.msra.mxu1 %v641_v56  ;;  %5170 = vmatprep.mubr.msk.f32.mxu1 %vm5824_vm1, %v5825_v20  ;;  %v6359_v56 = vld [vmem:[%s6861_s11] sm:$0x3] }
 0x660   : > { %5178 = vmatprep.subr.mxu1 %v5825_v20  ;;  %v2508_v57 = vrot.slane %v6359_v56, %v6007_v26  ;;  %v591_v26 = vld [vmem:[%s6856_s6 + $0x80] sm:$0xff] }
 0x662   : > { %5171 = vmatmul.mubr.msk.f32.vlgmr.msra.gmra.mrb[12].mxu1 %vm1566_vm2, %v1724_v35 }
 0x663   : > { %5179 = vmatpush3.msra.mxu1 %v1341_v59  ;;  %5180 = vmatprep.mubr.msk.f32.mxu1 %vm5824_vm1, %v5825_v20 }
 0x664   : > { %5188 = vmatprep.subr.mxu1 %v5825_v20 }
 0x731   : > { %v1885_v0 = vpop.f32.mrb[10].mxu1 }
 0x732   : > { %v5162_v1 = vpop.f32.mrb[11].mxu1  ;;  %5166 = vmatmul.mubr.msk.f32.vlgmr.msra.gmra.mrb[20].mxu0 %vm1566_vm2, %v1885_v0 }
 0x733   : > { %5174 = vmatpush3.xpose.msk.msra.mxu0 %vm1566_vm2, %v1267_v62  ;;  %5175 = vmatprep.mubr.msk.f32.mxu0 %vm5824_vm1, %v5825_v20 }
 0x734   : > { %5183 = vmatprep.subr.mxu0 %v5825_v20 }
 0x735   : > { %v2031_v5 = vpop.f32.mrb[12].mxu1 }
 0x736   : > { %v5172_v7 = vpop.f32.mrb[13].mxu1  ;;  %5176 = vmatmul.mubr.msk.f32.vlgmr.msra.gmra.mrb[22].mxu0 %vm1566_vm2, %v1193_v3 }
 0x737   : > { %5185 = vmatprep.mubr.msk.f32.mxu0 %vm5824_vm1, %v5825_v20  ;;  %5184 = vmatpush3.msra.mxu0 %v643_v21 }
 0x738   : > { %5193 = vmatprep.subr.mxu0 %v5825_v20 }
 0x805   : > { %v1958_v58 = vpop.f32.mrb[20].mxu0 }
 0x806   : > { %v2032_v8 = vadd.f32 %v2031_v5, %v1958_v58  ;;  %v5167_v9 = vpop.f32.mrb[21].mxu0 }
 0x807   : > { %v592_v9 = vld [vmem:[%s6856_s6 + $0x88] sm:$0xff] }
 0x809   : > { %v2107_v10 = vpop.f32.mrb[22].mxu0 }
 0x80a   : > { %v2111_v13 = vmul.f32 0.35355338, %v2107_v10  ;;  %v5177_v14 = vpop.f32.mrb[23].mxu0  ;;  %v5535_v10 = vpack.c.bf16 %v592_v9, %v591_v26  ;;  %v570_v26 = vld [vmem:[%s6854_s4 + $0xe0] sm:$0xff]  ;;  %v571_v9 = vld [vmem:[%s6854_s4 + $0xe8] sm:$0xff] }
 0x80c   : > { %v2112_v15 = vsel %vm1566_vm2, %v2111_v13, -inf }
 0x80d   : > { %2113 = vmax.xlane.f32.xlu0 %v2112_v15  ;;  %v6378_v15 = vld [vmem:[%s536_s27 + $0x8] sm:$0xff]  ;;  %s4801_s27 = sshll.u32 %s5933_s25, 7  ;;  %s5826_s25 = smov [#allocation2]  }
 0x80e   : > { %s6807_s18 = scalar_lea.hbm %s6866_s16, %s4801_s27  ;;  %s5763_s19 = sshll.u32 %s5826_s25, 4  ;;  %s5764_s19 = int_to_ptr.vmem [resolvable:$false] %s5763_s19 }
 0x80f   : > { %s5765_s1 = scalar_lea.vmem %s5764_s19, 256  ;;  %p5766_p0 = scmp.lt.s32.totalorder %s6809_s23, %s5764_s19 }
 0x810   : > { %p5767_p1 = scmp.lt.s32.totalorder %s5765_s1, %s5759_s26 }
 0x812   : > { %p5768_p2 = por %p5767_p1, %p5766_p0 }
 0x814   : > { %p5769_p3 = pnand %p5768_p2, %p5762_p13 }
 0x89a   : > { %v2114_v16 = vpop.xlane.xlu0 %2113 }
 0x89b   : > { %v2115_v4 = vsub.f32 %v2111_v13, %v2114_v16  ;;  %v594_v13 = vld [vmem:[%s6856_s6 + $0x98] sm:$0xff]  ;;  %v558_v16 = vld [vmem:[%s6854_s4 + $0x80] sm:$0xff] }
 0x89d   : > { %v2116_v17 = vmul.f32 1.442695, %v2115_v4  ;;  %v559_v4 = vld [vmem:[%s6854_s4 + $0x88] sm:$0xff] }
 0x89f   : > { %5727 = vpow2.f32 %v2116_v17  ;;  %v562_v17 = vld [vmem:[%s6854_s4 + $0xa0] sm:$0xff] }
 0x8a9   : > { %v5728_v18 = vpop.eup %5727 }
 0x8aa   : > { %v2118_v19 = vsel %vm1566_vm2, %v5728_v18, 0.0 }
 0x8ab   : > { %2119 = vadd.xlane.f32.xlu1 %v2118_v19  ;;  %v563_v19 = vld [vmem:[%s6854_s4 + $0xa8] sm:$0xff] }
 0x8ac   : > { %v5552_v21 = vpack.c.bf16 %v563_v19, %v562_v17  ;;  %v632_v17 = vld [vmem:[%s6858_s8 + $0xc0] sm:$0xff] }
 0x938   : > { %v2120_v22 = vpop.xlane.xlu1 %2119 }
 0x939   : > { %5729 = vrcp.f32 %v2120_v22  ;;  %v560_v22 = vld [vmem:[%s6854_s4 + $0x90] sm:$0xff] }
 0x93a   : > { %v5533_v29 = vpack.c.bf16 %v561_v23, %v560_v22  ;;  %v634_v23 = vld [vmem:[%s6858_s8 + $0xd0] sm:$0xff] }
 0x943   : > { %v5730_v24 = vpop.eup %5729 }
 0x944   : > { %v2122_v30 = vmul.f32 %v5730_v24, %v5728_v18  ;;  %v5530_v18 = vpack.c.bf16 %v559_v4, %v558_v16  ;;  %v564_v24 = vld [vmem:[%s6854_s4 + $0xb0] sm:$0xff]  ;;  %v573_v4 = vld [vmem:[%s6854_s4 + $0xf8] sm:$0xff] }
 0x945   : > { %v572_v16 = vld [vmem:[%s6854_s4 + $0xf0] sm:$0xff] }
 0x946   : > { %5181 = vmatmul.mubr.msk.f32.vlgmr.msra.gmra.mrb[14].mxu1 %vm1566_vm2, %v2122_v30  ;;  %v565_v30 = vld [vmem:[%s6854_s4 + $0xb8] sm:$0xff] }
 0x947   : > { %5189 = vmatpush3.xpose.msk.msra.mxu1 %vm1566_vm2, %v1489_v31  ;;  %5190 = vmatprep.mubr.msk.f32.mxu1 %vm5824_vm1, %v5825_v20  ;;  %v624_v31 = vld [vmem:[%s6858_s8 + $0x80] sm:$0xff] }
 0x948   : > { %5198 = vmatprep.subr.mxu1 %v5825_v20 }
 0x94a   : > { %5191 = vmatmul.mubr.msk.f32.vlgmr.msra.gmra.mrb[16].mxu1 %vm1566_vm2, %v1415_v32  ;;  %v625_v32 = vld [vmem:[%s6858_s8 + $0x88] sm:$0xff] }
 0x94b   : > { %5200 = vmatprep.mubr.msk.f32.mxu1 %vm5824_vm1, %v5825_v20 }
 0xa19   : > { %v2192_v2 = vpop.f32.mrb[14].mxu1 }
 0xa1a   : > { %v5182_v33 = vpop.f32.mrb[15].mxu1  ;;  %5186 = vmatmul.mubr.msk.f32.vlgmr.msra.gmra.mrb[24].mxu0 %vm1566_vm2, %v2192_v2  ;;  %v5555_v2 = vpack.c.bf16 %v565_v30, %v564_v24  ;;  %v635_v24 = vld [vmem:[%s6858_s8 + $0xd8] sm:$0xff]  ;;  %v603_v30 = vld [vmem:[%s6856_s6 + $0xe0] sm:$0xff] }
 0xa1b   : > { %5194 = vmatpush3.msra.mxu0 %v6259_v6  ;;  %5195 = vmatprep.mubr.msk.f32.mxu0 %vm5824_vm1, %v5825_v20  ;;  %v644_v6 = vld [vmem:[%s6860_s10 + $0x18] sm:$0xff]  ;;  %v5543_v33 = vpack.c.bf16 %v625_v32, %v624_v31  ;;  %v604_v31 = vld [vmem:[%s6856_s6 + $0xe8] sm:$0xff] }
 0xa1c   : > { %5529 = vmatprep.subr.bf16.mxu0 %v5823_v12  ;;  %5199 = vmatpush3.msra.mxu1 %v644_v6  ;;  %v2532_v6 = vrot.slane %v6017_v28, %v6226_v44  ;;  %v5601_v32 = vpack.c.bf16 %v604_v31, %v603_v30 }
 0xa1d   : > { %v2342_v11 = vpop.f32.mrb[16].mxu1  ;;  %5536 = vmatprep.subr.bf16.mxu1 %v5535_v10 }
 0xa1e   : > { %v2346_v63 = vmul.f32 0.35355338, %v2342_v11  ;;  %v5192_v34 = vpop.f32.mrb[17].mxu1  ;;  %v628_v11 = vld [vmem:[%s6858_s8 + $0xa0] sm:$0xff] }
 0xa20   : > { %v2347_v35 = vsel %vm1566_vm2, %v2346_v63, -inf }
 0xa21   : > { %2348 = vmax.xlane.f32.xlu0 %v2347_v35 }
 0xaae   : > { %v2349_v36 = vpop.xlane.xlu0 %2348 }
 0xaaf   : > { %v2350_v37 = vsub.f32 %v2346_v63, %v2349_v36  ;;  %v629_v63 = vld [vmem:[%s6858_s8 + $0xa8] sm:$0xff] }
 0xab0   : > { %v5565_v34 = vpack.c.bf16 %v629_v63, %v628_v11  ;;  %v2536_v63 = vsub.s32 4, %v6004_v25 }
 0xab1   : > { %v2351_v39 = vmul.f32 1.442695, %v2350_v37 }
 0xab3   : > { %5731 = vpow2.f32 %v2351_v39  ;;  %v2527_v39 = vrot.slane %v6012_v27, %v6226_v44  ;;  %v631_v27 = vld [vmem:[%s6858_s8 + $0xb8] sm:$0xff] }
 0xabd   : > { %v5732_v40 = vpop.eup %5731 }
 0xabe   : > { %v2353_v46 = vsel %vm1566_vm2, %v5732_v40, 0.0 }
 0xabf   : > { %2354 = vadd.xlane.f32.xlu1 %v2353_v46 }
 0xaed   : > { %v2265_v47 = vpop.f32.mrb[24].mxu0 }
 0xaee   : > { %v2269_v48 = vadd.f32 %v2265_v47, %v2032_v8  ;;  %v5187_v49 = vpop.f32.mrb[25].mxu0  ;;  %v626_v47 = vld [vmem:[%s6858_s8 + $0x90] sm:$0xff] }
 0xaef   : > { %v630_v49 = vld [vmem:[%s6858_s8 + $0xb0] sm:$0xff] }
 0xb4c   : > { %v2355_v38 = vpop.xlane.xlu1 %2354 }
 0xb4d   : > { %5733 = vrcp.f32 %v2355_v38 }
 0xb57   : > { %v5734_v50 = vpop.eup %5733 }
 0xb58   : > { %v2357_v51 = vmul.f32 %v5734_v50, %v5732_v40 }
 0xb5a   : > { %5196 = vmatmul.mubr.msk.f32.vlgmr.msra.gmra.mrb[26].mxu0 %vm1566_vm2, %v2357_v51  ;;  %v5569_v51 = vpack.c.bf16 %v631_v27, %v630_v49  ;;  %v639_v49 = vld [vmem:[%s6858_s8 + $0xf8] sm:$0xff] }
 0xb5b   : > { %5211 = vmatprep.mubr.msk.f32.mxu0 %vm5824_vm1, %v5825_v20  ;;  %5531 = vmatpush3.bf16.msra.mxu0 %v5530_v18  ;;  %v633_v18 = vld [vmem:[%s6858_s8 + $0xc8] sm:$0xff] }
 0xb5c   : > { %5532 = vmatprep.subr.bf16.mxu0 %v5823_v12  ;;  %v5587_v22 = vpack.c.bf16 %v633_v18, %v632_v17 }
 0xb5f   : > { %5534 = vmatpush3.bf16.msra.mxu0 %v5533_v29  ;;  %v5591_v29 = vpack.c.bf16 %v635_v24, %v634_v23 }
 0xb60   : > { %5544 = vmatprep.subr.bf16.mxu0 %v5543_v33 }
 0xc2d   : > { %v2427_v53 = vpop.f32.mrb[26].mxu0 }
 0xc2e   : > { %v5197_v55 = vpop.f32.mrb[27].mxu0  ;;  %5201 = vmatmul.mubr.msk.f32.vlgmr.msra.gmra.mrb[18].mxu1 %vm1566_vm2, %v2427_v53  ;;  %v595_v53 = vld [vmem:[%s6856_s6 + $0xa0] sm:$0xff] }
 0xc2f   : > { %5222 = vmatprep.mubr.msk.f32.mxu1 %vm650_vm0, %v6351_v52  ;;  %5538 = vmatpush3.bf16.msra.mxu1 %v5535_v10  ;;  %v596_v55 = vld [vmem:[%s6856_s6 + $0xa8] sm:$0xff] }
 0xd01   : > { %v2500_v59 = vpop.f32.mrb[18].mxu1 }
 0xd02   : > { %v2504_v60 = vadd.f32 %v2500_v59, %v2269_v48  ;;  %v5202_v61 = vpop.f32.mrb[19].mxu1  ;;  %v627_v48 = vld [vmem:[%s6858_s8 + $0x98] sm:$0xff]  ;;  %v600_v59 = vld [vmem:[%s6856_s6 + $0xc8] sm:$0xff] }
 0xd03   : > { %v5547_v28 = vpack.c.bf16 %v627_v48, %v626_v47  ;;  %v638_v47 = vld [vmem:[%s6858_s8 + $0xf0] sm:$0xff] }
 0xd04   : > { %v2509_v62 = vadd.f32 %v2508_v57, %v2504_v60  ;;  %v599_v57 = vld [vmem:[%s6856_s6 + $0xc0] sm:$0xff]  ;;  %v5557_v60 = vpack.c.bf16 %v596_v55, %v595_v53  ;;  %v5613_v27 = vpack.c.bf16 %v639_v49, %v638_v47 }
 0xd05   : > { %v5579_v61 = vpack.c.bf16 %v600_v59, %v599_v57 }
 0xd06   : > { %v2510_v0 = vadd.f32 %v2509_v62, %v6038_v41  ;;  %v593_v41 = vld [vmem:[%s6856_s6 + $0x90] sm:$0xff] }
 0xd07   : > { %v5539_v14 = vpack.c.bf16 %v594_v13, %v593_v41  ;;  %v597_v62 = vld [vmem:[%s6856_s6 + $0xb0] sm:$0xff]  ;;  %v5596_v41 = vpack.c.bf16 %v571_v9, %v570_v26  ;;  %v3009_v9 = vsub.s32 6, %v6004_v25 }
 0xd08   : > { %v2511_v1 = vsel %vm650_vm0, %v2510_v0, 0.0  ;;  %v568_v13 = vld [vmem:[%s6854_s4 + $0xd0] sm:$0xff] }
 0xd09   : > { %2512 = vadd.xlane.f32.xlu0 %v2511_v1  ;;  %5540 = vmatprep.subr.bf16.mxu1 %v5539_v14  ;;  %v601_v1 = vld [vmem:[%s6856_s6 + $0xd0] sm:$0xff]  ;;  %v3010_v30 = vrot.slane %v6231_v45, %v3009_v9 }
 0xd0a   : > { %5542 = vmatpush3.bf16.msra.mxu1 %v5539_v14  ;;  %v569_v14 = vld [vmem:[%s6854_s4 + $0xd8] sm:$0xff] }
 0xd0b   : > { %5551 = vmatprep.subr.bf16.mxu1 %v5823_v12  ;;  %v5577_v19 = vpack.c.bf16 %v569_v14, %v568_v13  ;;  %v3084_v14 = vrot.slane %v6218_v42, %v3009_v9 }
 0xd0d   : > { %5223 = vmatmul.mubr.msk.f32.vlgmr.msra.gmra.mrb[20].mxu1 %vm650_vm0, %v6378_v15 }
 0xd0e   : > { %5244 = vmatprep.mubr.msk.f32.mxu1 %vm5824_vm1, %v5825_v20  ;;  %5553 = vmatpush3.bf16.msra.mxu1 %v5552_v21  ;;  %v5599_v21 = vpack.c.bf16 %v573_v4, %v572_v16 }
 0xd0f   : > { %5554 = vmatprep.subr.bf16.mxu1 %v5823_v12 }
 0xd12   : > { %5556 = vmatpush3.bf16.msra.mxu1 %v5555_v2  ;;  %v605_v2 = vld [vmem:[%s6856_s6 + $0xf0] sm:$0xff] }
 0xd13   : > { %5566 = vmatprep.subr.bf16.mxu1 %v5565_v34 }
 0xd96   : > { %v2513_v3 = vpop.xlane.xlu0 %2512 }
 0xd97   : > { %v2514_v5 = vmul.f32 0.03125, %v2513_v3  ;;  %v602_v3 = vld [vmem:[%s6856_s6 + $0xd8] sm:$0xff] }
 0xd99   : > { %v2515_v7 = vsub.f32 %v2510_v0, %v2514_v5  ;;  %v598_v0 = vld [vmem:[%s6856_s6 + $0xb8] sm:$0xff] }
 0xd9a   : > { %v5561_v5 = vpack.c.bf16 %v598_v0, %v597_v62 }
 0xd9b   : > { %v2516_v58 = vmul.f32 %v2515_v7, %v2515_v7 }
 0xd9d   : > { %v2517_v8 = vsel %vm650_vm0, %v2516_v58, 0.0  ;;  %v566_v58 = vld [vmem:[%s6854_s4 + $0xc0] sm:$0xff] }
 0xd9e   : > { %2518 = vadd.xlane.f32.xlu1 %v2517_v8  ;;  %v567_v8 = vld [vmem:[%s6854_s4 + $0xc8] sm:$0xff] }
 0xd9f   : > { %v5574_v10 = vpack.c.bf16 %v567_v8, %v566_v58 }
 0xe2b   : > { %v2519_v35 = vpop.xlane.xlu1 %2518 }
 0xe2c   : > { %v2520_v36 = vmul.f32 0.03125, %v2519_v35  ;;  %v5224_v35 = vpop.f32.mrb[20].mxu1 }
 0xe2e   : > { %v2521_v37 = vadd.f32 1e-05, %v2520_v36 }
 0xe30   : > { %5735 = vrsqrt.f32 %v2521_v37  ;;  %v2687_v37 = vpop.f32.mrb[21].mxu1 }
 0xe3a   : > { %v5736_v40 = vpop.eup %5735 }
 0xe3b   : > { %v2523_v46 = vmul.f32 %v5736_v40, %v2515_v7  ;;  %v5583_v7 = vpack.c.bf16 %v602_v3, %v601_v1 }
 0xe3d   : > { %v2528_v38 = vmul.f32 %v2527_v39, %v2523_v46  ;;  %v636_v46 = vld [vmem:[%s6858_s8 + $0xe0] sm:$0xff] }
 0xe3f   : > { %v6439_v50 = vadd.f32 %v2532_v6, %v2528_v38  ;;  %v637_v6 = vld [vmem:[%s6858_s8 + $0xe8] sm:$0xff]  ;;  %v2777_v38 = vsub.s32 5, %v6004_v25 }
 0xe40   : > { %v5609_v48 = vpack.c.bf16 %v637_v6, %v636_v46 }
 0xe41   : > { %5212 = vmatmul.mubr.msk.f32.vlgmr.msra.gmra.mrb[28].mxu0 %vm650_vm0, %v6439_v50  ;;  %5245 = vmatmul.mubr.msk.f32.vlgmr.msra.gmra.mrb[22].mxu1 %vm650_vm0, %v6439_v50  ;;  %v2931_v62 = vrot.slane %v6223_v43, %v2777_v38  ;;  %v2852_v13 = vrot.slane %v6218_v42, %v2777_v38 }
 0xe42   : > { %5546 = vmatpush3.bf16.msra.mxu0 %v5543_v33  ;;  %5568 = vmatpush3.bf16.msra.mxu1 %v5565_v34  ;;  %v606_v33 = vld [vmem:[%s6856_s6 + $0xf8] sm:$0xff]  ;;  %v2614_v34 = vrot.slane %v6218_v42, %v2536_v63 }
 0xe43   : > { %5548 = vmatprep.subr.bf16.mxu0 %v5547_v28  ;;  %5570 = vmatprep.subr.bf16.mxu1 %v5569_v51  ;;  %v5605_v11 = vpack.c.bf16 %v606_v33, %v605_v2 }
 0xe44   : > { %5233 = vmatprep.mubr.msk.f32.mxu0 %vm650_vm0, %v6351_v52  ;;  %5266 = vmatprep.mubr.msk.f32.mxu1 %vm650_vm0, %v6351_v52  ;;  %v2693_v36 = vadd.f32 %v5224_v35, %v2614_v34  ;;  %v2688_v39 = vadd.f32 %v2687_v37, %v2614_v34 }
 0xe46   : > { %5550 = vmatpush3.bf16.msra.mxu0 %v5547_v28  ;;  %5572 = vmatpush3.bf16.msra.mxu1 %v5569_v51  ;;  %v5618_v40 = vpack.c.bf16 %v2693_v36, %v2688_v39  ;;  %v2537_v28 = vrot.slane %v6231_v45, %v2536_v63  ;;  %v2778_v51 = vrot.slane %v6231_v45, %v2777_v38  ;;  %v6614_v39 = vsub.s32 7, %v6004_v25 }
 0xe47   : > { %5558 = vmatprep.subr.bf16.mxu0 %v5557_v60  ;;  %5580 = vmatprep.subr.bf16.mxu1 %v5579_v61 }
 0xe48   : > { %v3316_v46 = vrot.slane %v6218_v42, %v6614_v39 }
 0xe49   : > { %5234 = vmatmul.mubr.msk.f32.vlgmr.msra.gmra.mrb[30].mxu0 %vm650_vm0, %v6378_v15  ;;  %5267 = vmatmul.mubr.msk.f32.vlgmr.msra.gmra.mrb[24].mxu1 %vm650_vm0, %v6378_v15 }
 0xe4a   : > { %5560 = vmatpush3.bf16.msra.mxu0 %v5557_v60  ;;  %5582 = vmatpush3.bf16.msra.mxu1 %v5579_v61 }
 0xe4b   : > { %5562 = vmatprep.subr.bf16.mxu0 %v5561_v5  ;;  %5584 = vmatprep.subr.bf16.mxu1 %v5583_v7 }
 0xe4c   : > { %5255 = vmatprep.mubr.msk.f32.mxu0 %vm650_vm0, %v6351_v52  ;;  %5288 = vmatprep.mubr.msk.f32.mxu1 %vm650_vm0, %v6351_v52 }
 0xe4e   : > { %5564 = vmatpush3.bf16.msra.mxu0 %v5561_v5  ;;  %5586 = vmatpush3.bf16.msra.mxu1 %v5583_v7 }
 0xe4f   : > { %5573 = vmatprep.subr.bf16.mxu0 %v5823_v12  ;;  %5595 = vmatprep.subr.bf16.mxu1 %v5823_v12 }
 0xe51   : > { %5256 = vmatmul.mubr.msk.f32.vlgmr.msra.gmra.mrb[32].mxu0 %vm650_vm0, %v6378_v15  ;;  %5289 = vmatmul.mubr.msk.f32.vlgmr.msra.gmra.mrb[26].mxu1 %vm650_vm0, %v6378_v15 }
 0xe52   : > { %5575 = vmatpush3.bf16.msra.mxu0 %v5574_v10  ;;  %5597 = vmatpush3.bf16.msra.mxu1 %v5596_v41 }
 0xe53   : > { %5576 = vmatprep.subr.bf16.mxu0 %v5823_v12  ;;  %5598 = vmatprep.subr.bf16.mxu1 %v5823_v12 }
 0xe54   : > { %5277 = vmatprep.mubr.msk.f32.mxu0 %vm5824_vm1, %v5825_v20  ;;  %5310 = vmatprep.mubr.msk.f32.mxu1 %vm5824_vm1, %v5825_v20 }
 0xe56   : > { %5578 = vmatpush3.bf16.msra.mxu0 %v5577_v19  ;;  %5600 = vmatpush3.bf16.msra.mxu1 %v5599_v21 }
 0xe57   : > { %5588 = vmatprep.subr.bf16.mxu0 %v5587_v22  ;;  %5610 = vmatprep.subr.bf16.mxu1 %v5609_v48 }
 0xe59   : > { %5278 = vmatmul.mubr.msk.f32.vlgmr.msra.gmra.mrb[34].mxu0 %vm650_vm0, %v6439_v50  ;;  %5311 = vmatmul.mubr.msk.f32.vlgmr.msra.gmra.mrb[28].mxu1 %vm650_vm0, %v6439_v50 }
 0xe5a   : > { %5590 = vmatpush3.bf16.msra.mxu0 %v5587_v22  ;;  %5299 = vmatprep.mubr.msk.f32.mxu0 %vm650_vm0, %v6351_v52 }
 0xe5b   : > { %5592 = vmatprep.subr.bf16.mxu0 %v5591_v29  ;;  %5332 = vmatprep.mubr.msk.f32.mxu1 %vm650_vm0, %v6351_v52 }
 0xe5c   : > { %5612 = vmatpush3.bf16.msra.mxu1 %v5609_v48 }
 0xe5d   : > { %5614 = vmatprep.subr.bf16.mxu1 %v5613_v27 }
 0xe5e   : > { %5594 = vmatpush3.bf16.msra.mxu0 %v5591_v29 }
 0xe5f   : > { %5602 = vmatprep.subr.bf16.mxu0 %v5601_v32 }
 0xe60   : > { %5616 = vmatpush3.bf16.msra.mxu1 %v5613_v27 }
 0xe61   : > { %5300 = vmatmul.mubr.msk.f32.vlgmr.msra.gmra.mrb[36].mxu0 %vm650_vm0, %v6378_v15  ;;  %5621 = vmatprep.subr.bf16.mxu1 %v5823_v12 }
 0xe62   : > { %5604 = vmatpush3.bf16.msra.mxu0 %v5601_v32  ;;  %5321 = vmatprep.mubr.msk.f32.mxu0 %vm650_vm0, %v6351_v52 }
 0xe63   : > { %5606 = vmatprep.subr.bf16.mxu0 %v5605_v11  ;;  %5333 = vmatmul.mubr.msk.f32.vlgmr.msra.gmra.mrb[30].mxu1 %vm650_vm0, %v6378_v15 }
 0xe64   : > { %5346 = vmatprep.mubr.msk.f32.mxu1 %vm5824_vm1, %v5825_v20 }
 0xe66   : > { %5608 = vmatpush3.bf16.msra.mxu0 %v5605_v11 }
 0xe67   : > { %5617 = vmatprep.subr.bf16.mxu0 %v5823_v12 }
 0xe69   : > { %5322 = vmatmul.mubr.msk.f32.vlgmr.msra.gmra.mrb[38].mxu0 %vm650_vm0, %v6378_v15  ;;  %v2699_v15 = vrot.slane %v6223_v43, %v2536_v63  ;;  %v3163_v63 = vrot.slane %v6223_v43, %v3009_v9 }
 0xe6a   : > { %5339 = vmatprep.mubr.msk.f32.mxu0 %vm5824_vm1, %v5825_v20 }
 0xe6f   : > { %5620 = vmatpush3.bf16.xpose.msk.msra.mxu0 %vm6562_vm3, %v5618_v40 }
 0xe70   : > { %5628 = vmatprep.subr.bf16.mxu0 %v5823_v12 }
 0xf14   : > { %v2607_v53 = vpop.f32.mrb[28].mxu0  ;;  %v2845_v55 = vpop.f32.mrb[22].mxu1 }
 0xf15   : > { %v2608_v57 = vadd.f32 %v2607_v53, %v2537_v28  ;;  %v6589_v59 = vadd.f32 %v2845_v55, %v2778_v51  ;;  %v5213_v60 = vpop.f32.mrb[29].mxu0  ;;  %v5246_v61 = vpop.f32.mrb[23].mxu1 }
 0xf16   : > { %v3395_v61 = vrot.slane %v6223_v43, %v6614_v39  ;;  %v645_v43 = vld [vmem:[%s6860_s10 + $0x20] sm:$0xff] }
 0xf17   : > { %5340 = vmatmul.mubr.msk.f32.vlgmr.msra.gmra.mrb[40].mxu0 %vm1566_vm2, %v2608_v57 }
 0xf18   : > { %5360 = vmatprep.mubr.msk.f32.mxu0 %vm5824_vm1, %v5825_v20 }
 0xf1c   : > { %v5235_v0 = vpop.f32.mrb[30].mxu0  ;;  %v5268_v1 = vpop.f32.mrb[24].mxu1 }
 0xf1d   : > { %v2772_v3 = vadd.f32 %v5235_v0, %v2699_v15  ;;  %v3004_v5 = vadd.f32 %v5268_v1, %v2931_v62  ;;  %v2766_v7 = vpop.f32.mrb[31].mxu0  ;;  %v2998_v58 = vpop.f32.mrb[25].mxu1 }
 0xf1e   : > { %v2767_v8 = vadd.f32 %v2766_v7, %v2699_v15  ;;  %v2999_v26 = vadd.f32 %v2998_v58, %v2931_v62 }
 0xf20   : > { %v5622_v10 = vpack.c.bf16 %v2772_v3, %v2767_v8  ;;  %v5629_v41 = vpack.c.bf16 %v3004_v5, %v2999_v26 }
 0xf22   : > { %5623 = vmatpush3.bf16.msra.mxu1 %v5622_v10  ;;  %5630 = vmatpush3.bf16.msra.mxu0 %v5629_v41 }
 0xf23   : > { %5624 = vmatprep.subr.bf16.mxu1 %v5823_v12  ;;  %5363 = vmatprep.subr.mxu0 %v5825_v20 }
 0xf24   : > { %v5257_v16 = vpop.f32.mrb[32].mxu0  ;;  %v5290_v4 = vpop.f32.mrb[26].mxu1 }
 0xf25   : > { %v2925_v17 = vadd.f32 %v5257_v16, %v2852_v13  ;;  %v6601_v18 = vadd.f32 %v5290_v4, %v3084_v14  ;;  %v2919_v19 = vpop.f32.mrb[33].mxu0  ;;  %v3151_v21 = vpop.f32.mrb[27].mxu1 }
 0xf26   : > { %v2920_v22 = vadd.f32 %v2919_v19, %v2852_v13  ;;  %v6603_v23 = vadd.f32 %v3151_v21, %v3084_v14 }
 0xf28   : > { %v5625_v24 = vpack.c.bf16 %v2925_v17, %v2920_v22  ;;  %v5632_v29 = vpack.c.bf16 %v6601_v18, %v6603_v23  ;;  %v3242_v18 = vrot.slane %v6231_v45, %v6614_v39 }
 0xf2c   : > { %v3077_v31 = vpop.f32.mrb[34].mxu0  ;;  %v6608_v32 = vpop.f32.mrb[28].mxu1 }
 0xf2d   : > { %v6610_v2 = vadd.f32 %v3077_v31, %v3010_v30  ;;  %v5279_v33 = vpop.f32.mrb[35].mxu0  ;;  %v5312_v11 = vpop.f32.mrb[29].mxu1  ;;  %v646_v31 = vld [vmem:[%s6860_s10 + $0x28] sm:$0xff]  ;;  %v3310_v23 = vadd.f32 %v6608_v32, %v3242_v18  ;;  %v4545_v18 = vld [vmem:[%s6864_s14 + $0x20] sm:$0xff] }
 0xf34   : > { %v5301_v34 = vpop.f32.mrb[36].mxu0 }
 0xf35   : > { %v3236_v35 = vadd.f32 %v5301_v34, %v3163_v63  ;;  %v3230_v36 = vpop.f32.mrb[37].mxu0 }
 0xf36   : > { %v3231_v37 = vadd.f32 %v3230_v36, %v3163_v63  ;;  %v5334_v15 = vpop.f32.mrb[30].mxu1 }
 0xf37   : > { %v3462_v62 = vpop.f32.mrb[31].mxu1  ;;  %v6628_v0 = vadd.f32 %v5334_v15, %v3395_v61 }
 0xf38   : > { %v5636_v40 = vpack.c.bf16 %v3236_v35, %v3231_v37  ;;  %v6630_v1 = vadd.f32 %v3462_v62, %v3395_v61 }
 0xf3a   : > { %v5643_v3 = vpack.c.bf16 %v6628_v0, %v6630_v1 }
 0xf3c   : > { %v5323_v6 = vpop.f32.mrb[38].mxu0 }
 0xf3d   : > { %v6618_v47 = vadd.f32 %v5323_v6, %v3316_v46  ;;  %v3383_v48 = vpop.f32.mrb[39].mxu0 }
 0xf3e   : > { %v6620_v49 = vadd.f32 %v3383_v48, %v3316_v46 }
 0xf40   : > { %v5639_v27 = vpack.c.bf16 %v6618_v47, %v6620_v49 }
 0xfea   : > { %v3546_v38 = vpop.f32.mrb[40].mxu0 }
 0xfeb   : > { %v3550_v28 = vmul.f32 0.35355338, %v3546_v38  ;;  %v5341_v51 = vpop.f32.mrb[41].mxu0 }
 0xfed   : > { %v3552_v25 = vsel %vm3551_vm4, %v3550_v28, -inf }
 0xfee   : > { %3553 = vmax.xlane.f32.xlu0 %v3552_v25 }
0x107b   : > { %v3554_v53 = vpop.xlane.xlu0 %3553 }
0x107c   : > { %v3555_v55 = vsub.f32 %v3550_v28, %v3554_v53 }
0x107e   : > { %v3556_v57 = vmul.f32 1.442695, %v3555_v55 }
0x1080   : > { %5737 = vpow2.f32 %v3556_v57  ;;  %v647_v57 = vld [vmem:[%s6860_s10 + $0x30] sm:$0xff] }
0x108a   : > { %v5738_v42 = vpop.eup %5737 }
0x108b   : > { %v3558_v60 = vsel %vm3551_vm4, %v5738_v42, 0.0 }
0x108c   : > { %3559 = vadd.xlane.f32.xlu1 %v3558_v60 }
0x1119   : > { %v3560_v5 = vpop.xlane.xlu1 %3559 }
0x111a   : > { %5739 = vrcp.f32 %v3560_v5  ;;  %v648_v5 = vld [vmem:[%s6860_s10 + $0x38] sm:$0xff] }
0x1124   : > { %v5740_v7 = vpop.eup %5739 }
0x1125   : > { %v3562_v58 = vmul.f32 %v5740_v7, %v5738_v42 }
0x1127   : > { %5347 = vmatmul.mubr.msk.f32.vlgmr.msra.gmra.mrb[32].mxu1 %vm3551_vm4, %v3562_v58 }
0x1128   : > { %5627 = vmatpush3.bf16.xpose.msk.msra.mxu1 %vm6562_vm3, %v5625_v24  ;;  %5353 = vmatprep.mubr.msk.f32.mxu1 %vm5824_vm1, %v5825_v20 }
0x1129   : > { %5368 = vmatprep.subr.mxu1 %v5825_v20 }
0x112f   : > { %5354 = vmatmul.mubr.msk.f32.vlgmr.msra.gmra.mrb[34].mxu1 %vm1566_vm2, %v6589_v59 }
0x1130   : > { %5369 = vmatpush3.msra.mxu1 %v645_v43  ;;  %5370 = vmatprep.mubr.msk.f32.mxu1 %vm5824_vm1, %v5825_v20  ;;  %v4425_v43 = vrot.slane %v6359_v56, %v6226_v44  ;;  %v4452_v44 = vld [vmem:[%s6862_s12 + $0x8] sm:$0xff] }
0x1131   : > { %5635 = vmatprep.subr.bf16.mxu1 %v5823_v12 }
0x11fa   : > { %v3632_v8 = vpop.f32.mrb[32].mxu1 }
0x11fb   : > { %v5348_v26 = vpop.f32.mrb[33].mxu1  ;;  %5371 = vmatmul.mubr.msk.f32.vlgmr.msra.gmra.mrb[36].mxu1 %vm1566_vm2, %v3632_v8 }
0x11fc   : > { %5637 = vmatpush3.bf16.msra.mxu1 %v5636_v40  ;;  %5384 = vmatprep.mubr.msk.f32.mxu1 %vm5824_vm1, %v5825_v20 }
0x11fd   : > { %5387 = vmatprep.subr.mxu1 %v5825_v20 }
0x1202   : > { %v3711_v9 = vpop.f32.mrb[34].mxu1 }
0x1203   : > { %v3715_v10 = vmul.f32 0.35355338, %v3711_v9  ;;  %v5355_v41 = vpop.f32.mrb[35].mxu1 }
0x1205   : > { %v3716_v59 = vsel %vm3551_vm4, %v3715_v10, -inf }
0x1206   : > { %3717 = vmax.xlane.f32.xlu0 %v3716_v59 }
0x1293   : > { %v3718_v13 = vpop.xlane.xlu0 %3717 }
0x1294   : > { %v3719_v14 = vsub.f32 %v3715_v10, %v3718_v13 }
0x1296   : > { %v3720_v16 = vmul.f32 1.442695, %v3719_v14 }
0x1298   : > { %5741 = vpow2.f32 %v3720_v16 }
0x12a2   : > { %v5742_v4 = vpop.eup %5741 }
0x12a3   : > { %v3722_v17 = vsel %vm3551_vm4, %v5742_v4, 0.0 }
0x12a4   : > { %3723 = vadd.xlane.f32.xlu1 %v3722_v17 }
0x12ce   : > { %v3942_v19 = vpop.f32.mrb[36].mxu1 }
0x12cf   : > { %v5372_v21 = vpop.f32.mrb[37].mxu1 }
0x1331   : > { %v3724_v22 = vpop.xlane.xlu1 %3723 }
0x1332   : > { %5743 = vrcp.f32 %v3724_v22  ;;  %v4541_v22 = vld [vmem:[%s6864_s14] sm:$0xff] }
0x133c   : > { %v5744_v24 = vpop.eup %5743 }
0x133d   : > { %v3726_v30 = vmul.f32 %v5744_v24, %v5742_v4  ;;  %v4542_v24 = vld [vmem:[%s6864_s14 + $0x8] sm:$0xff] }
0x133f   : > { %5361 = vmatmul.mubr.msk.f32.vlgmr.msra.gmra.mrb[42].mxu0 %vm3551_vm4, %v3726_v30  ;;  %v4543_v30 = vld [vmem:[%s6864_s14 + $0x10] sm:$0xff] }
0x1340   : > { %5364 = vmatpush3.msra.mxu0 %v646_v31  ;;  %5365 = vmatprep.mubr.msk.f32.mxu0 %vm5824_vm1, %v5825_v20  ;;  %v5652_v31 = vpack.c.bf16 %v4542_v24, %v4541_v22 }
0x1341   : > { %5631 = vmatprep.subr.bf16.mxu0 %v5823_v12 }
0x1412   : > { %v3796_v33 = vpop.f32.mrb[42].mxu0 }
0x1413   : > { %v5362_v11 = vpop.f32.mrb[43].mxu0  ;;  %5366 = vmatmul.mubr.msk.f32.vlgmr.msra.gmra.mrb[44].mxu0 %vm1566_vm2, %v3796_v33  ;;  %v4544_v33 = vld [vmem:[%s6864_s14 + $0x18] sm:$0xff] }
0x1414   : > { %5634 = vmatpush3.bf16.xpose.msk.msra.mxu0 %vm6562_vm3, %v5632_v29  ;;  %5377 = vmatprep.mubr.msk.f32.mxu0 %vm5824_vm1, %v5825_v20  ;;  %v5655_v11 = vpack.c.bf16 %v4544_v33, %v4543_v30 }
0x1415   : > { %5638 = vmatprep.subr.bf16.mxu0 %v5823_v12 }
0x141b   : > { %5378 = vmatmul.mubr.msk.f32.vlgmr.msra.gmra.mrb[46].mxu0 %vm1566_vm2, %v6610_v2 }
0x141c   : > { %5641 = vmatpush3.bf16.xpose.msk.msra.mxu0 %vm6562_vm3, %v5639_v27  ;;  %5396 = vmatprep.mubr.msk.f32.mxu0 %vm5824_vm1, %v5825_v20 }
0x141d   : > { %5645 = vmatprep.subr.bf16.mxu0 %v5823_v12 }
0x1423   : > { %5397 = vmatmul.mubr.msk.f32.vlgmr.msra.gmra.mrb[48].mxu0 %vm1566_vm2, %v3310_v23  ;;  %v4546_v23 = vld [vmem:[%s6864_s14 + $0x28] sm:$0xff] }
0x1424   : > { %5419 = vmatprep.mubr.msk.f32.mxu0 %vm5824_vm1, %v5825_v20 }
0x14e6   : > { %v3869_v29 = vpop.f32.mrb[44].mxu0 }
0x14e7   : > { %v3943_v2 = vadd.f32 %v3942_v19, %v3869_v29  ;;  %v5367_v63 = vpop.f32.mrb[45].mxu0  ;;  %v4454_v19 = vld [vmem:[%s6862_s12 + $0x18] sm:$0xff]  ;;  %v5658_v29 = vpack.c.bf16 %v4546_v23, %v4545_v18 }
0x14ee   : > { %v4021_v52 = vpop.f32.mrb[46].mxu0 }
0x14ef   : > { %v4025_v34 = vmul.f32 0.35355338, %v4021_v52  ;;  %v5379_v35 = vpop.f32.mrb[47].mxu0 }
0x14f1   : > { %v4026_v36 = vsel %vm3551_vm4, %v4025_v34, -inf }
0x14f2   : > { %4027 = vmax.xlane.f32.xlu0 %v4026_v36 }
0x14f6   : > { %v4259_v37 = vpop.f32.mrb[48].mxu0 }
0x14f7   : > { %v4263_v45 = vmul.f32 0.35355338, %v4259_v37  ;;  %v5398_v39 = vpop.f32.mrb[49].mxu0 }
0x14f9   : > { %v4264_v40 = vsel %vm3551_vm4, %v4263_v45, -inf }
0x14fa   : > { %4265 = vmax.xlane.f32.xlu0 %v4264_v40 }
0x157f   : > { %v4028_v32 = vpop.xlane.xlu0 %4027 }
0x1580   : > { %v4029_v46 = vsub.f32 %v4025_v34, %v4028_v32  ;;  %v5757_v34 = vld [vmem:[%s6852_s2] sm:$0x7] }
0x1581   : > { %v4444_v35 = vrot.slane %v5757_v34, %v6285_v54 }
0x1582   : > { %v4030_v6 = vmul.f32 1.442695, %v4029_v46  ;;  %v4547_v46 = vld [vmem:[%s6864_s14 + $0x30] sm:$0xff] }
0x1584   : > { %5745 = vpow2.f32 %v4030_v6  ;;  %v4548_v6 = vld [vmem:[%s6864_s14 + $0x38] sm:$0xff] }
0x1587   : > { %v4266_v47 = vpop.xlane.xlu0 %4265 }
0x1588   : > { %v4267_v48 = vsub.f32 %v4263_v45, %v4266_v47  ;;  %v5758_v45 = vld [vmem:[%s6853_s3] sm:$0x7]  ;;  %v5661_v47 = vpack.c.bf16 %v4548_v6, %v4547_v46 }
0x1589   : > { %v4449_v39 = vrot.slane %v5758_v45, %v6285_v54  ;;  %v4549_v54 = vld [vmem:[%s6864_s14 + $0x40] sm:$0xff] }
0x158a   : > { %v4268_v49 = vmul.f32 1.442695, %v4267_v48  ;;  %v4550_v48 = vld [vmem:[%s6864_s14 + $0x48] sm:$0xff] }
0x158c   : > { %5747 = vpow2.f32 %v4268_v49  ;;  %v5664_v49 = vpack.c.bf16 %v4550_v48, %v4549_v54 }
0x158e   : > { %v5746_v27 = vpop.eup %5745 }
0x158f   : > { %v4032_v38 = vsel %vm3551_vm4, %v5746_v27, 0.0 }
0x1590   : > { %4033 = vadd.xlane.f32.xlu1 %v4032_v38  ;;  %v4552_v38 = vld [vmem:[%s6864_s14 + $0x58] sm:$0xff] }
0x1596   : > { %v5748_v28 = vpop.eup %5747 }
0x1597   : > { %v4270_v51 = vsel %vm3551_vm4, %v5748_v28, 0.0 }
0x1598   : > { %4271 = vadd.xlane.f32.xlu1 %v4270_v51  ;;  %v4553_v51 = vld [vmem:[%s6864_s14 + $0x60] sm:$0xff] }
0x161d   : > { %v4034_v25 = vpop.xlane.xlu1 %4033 }
0x161e   : > { %5749 = vrcp.f32 %v4034_v25  ;;  %v4554_v25 = vld [vmem:[%s6864_s14 + $0x68] sm:$0xff] }
0x1625   : > { %v4272_v42 = vpop.xlane.xlu1 %4271 }
0x1626   : > { %5751 = vrcp.f32 %v4272_v42 }
0x1628   : > { %v5750_v53 = vpop.eup %5749 }
0x1629   : > { %v4036_v55 = vmul.f32 %v5750_v53, %v5746_v27  ;;  %v4551_v27 = vld [vmem:[%s6864_s14 + $0x50] sm:$0xff]  ;;  %v5670_v53 = vpack.c.bf16 %v4554_v25, %v4553_v51 }
0x162b   : > { %5385 = vmatmul.mubr.msk.f32.vlgmr.msra.gmra.mrb[38].mxu1 %vm3551_vm4, %v4036_v55  ;;  %v4555_v55 = vld [vmem:[%s6864_s14 + $0x70] sm:$0xff] }
0x162c   : > { %5388 = vmatpush3.msra.mxu1 %v647_v57  ;;  %5389 = vmatprep.mubr.msk.f32.mxu1 %vm5824_vm1, %v5825_v20  ;;  %v4556_v57 = vld [vmem:[%s6864_s14 + $0x78] sm:$0xff] }
0x162d   : > { %5642 = vmatprep.subr.bf16.mxu1 %v5823_v12  ;;  %v5673_v42 = vpack.c.bf16 %v4556_v57, %v4555_v55 }
0x1630   : > { %v5752_v60 = vpop.eup %5751 }
0x1631   : > { %v4274_v62 = vmul.f32 %v5752_v60, %v5748_v28  ;;  %v5667_v28 = vpack.c.bf16 %v4552_v38, %v4551_v27  ;;  %v4797_v60 = vld [vmem:[%s6863_s13] ss:$0 sm:$0xff] }
0x16fe   : > { %v4106_v61 = vpop.f32.mrb[38].mxu1 }
0x16ff   : > { %v5386_v15 = vpop.f32.mrb[39].mxu1  ;;  %5390 = vmatmul.mubr.msk.f32.vlgmr.msra.gmra.mrb[40].mxu1 %vm1566_vm2, %v4106_v61 }
0x1700   : > { %5644 = vmatpush3.bf16.msra.mxu1 %v5643_v3  ;;  %5403 = vmatprep.mubr.msk.f32.mxu1 %vm5824_vm1, %v5825_v20 }
0x1701   : > { %5406 = vmatprep.subr.mxu1 %v5825_v20 }
0x1703   : > { %5404 = vmatmul.mubr.msk.f32.vlgmr.msra.gmra.mrb[42].mxu1 %vm3551_vm4, %v4274_v62 }
0x1704   : > { %5408 = vmatprep.mubr.msk.f32.mxu1 %vm5824_vm1, %v5825_v20  ;;  %5407 = vmatpush3.msra.mxu1 %v648_v5 }
0x1705   : > { %5651 = vmatprep.subr.bf16.mxu1 %v5823_v12 }
0x17d2   : > { %v4179_v0 = vpop.f32.mrb[40].mxu1 }
0x17d3   : > { %v4183_v1 = vadd.f32 %v4179_v0, %v3943_v2  ;;  %v5391_v3 = vpop.f32.mrb[41].mxu1 }
0x17d6   : > { %v4344_v7 = vpop.f32.mrb[42].mxu1 }
0x17d7   : > { %v5405_v58 = vpop.f32.mrb[43].mxu1  ;;  %5409 = vmatmul.mubr.msk.f32.vlgmr.msra.gmra.mrb[44].mxu1 %vm1566_vm2, %v4344_v7  ;;  %v4799_v7 = vld [vmem:[%s6865_s15] ss:$0 sm:$0xff] }
0x17d8   : > { %5454 = vmatprep.mubr.msk.f32.mxu1 %vm5824_vm1, %v5825_v20  ;;  %v4451_v20 = vld [vmem:[%s6862_s12] sm:$0xff]  ;;  %5653 = vmatpush3.bf16.msra.mxu1 %v5652_v31 }
0x17d9   : > { %v5646_v56 = vpack.c.bf16 %v4452_v44, %v4451_v20  ;;  %5654 = vmatprep.subr.bf16.mxu1 %v5823_v12 }
0x17db   : > { %5647 = vmatpush3.bf16.msra.mxu0 %v5646_v56 }
0x17dc   : > { %5648 = vmatprep.subr.bf16.mxu0 %v5823_v12  ;;  %5656 = vmatpush3.bf16.msra.mxu1 %v5655_v11 }
0x17dd   : > { %5657 = vmatprep.subr.bf16.mxu1 %v5823_v12 }
0x17e0   : > { %5659 = vmatpush3.bf16.msra.mxu1 %v5658_v29 }
0x17e1   : > { %5660 = vmatprep.subr.bf16.mxu1 %v5823_v12 }
0x17e4   : > { %5662 = vmatpush3.bf16.msra.mxu1 %v5661_v47 }
0x17e5   : > { %5663 = vmatprep.subr.bf16.mxu1 %v5823_v12 }
0x17e8   : > { %5665 = vmatpush3.bf16.msra.mxu1 %v5664_v49 }
0x17e9   : > { %5666 = vmatprep.subr.bf16.mxu1 %v5823_v12 }
0x17ec   : > { %5668 = vmatpush3.bf16.msra.mxu1 %v5667_v28 }
0x17ed   : > { %5669 = vmatprep.subr.bf16.mxu1 %v5823_v12 }
0x17f0   : > { %5671 = vmatpush3.bf16.msra.mxu1 %v5670_v53 }
0x17f1   : > { %5672 = vmatprep.subr.bf16.mxu1 %v5823_v12 }
0x17f4   : > { %5674 = vmatpush3.bf16.msra.mxu1 %v5673_v42 }
0x18aa   : > { %v4417_v8 = vpop.f32.mrb[44].mxu1 }
0x18ab   : > { %v4421_v26 = vadd.f32 %v4417_v8, %v4183_v1  ;;  %v5410_v9 = vpop.f32.mrb[45].mxu1 }
0x18ad   : > { %v4426_v10 = vadd.f32 %v4425_v43, %v4421_v26 }
0x18af   : > { %v4427_v41 = vadd.f32 %v4426_v10, %v6439_v50  ;;  %v4453_v50 = vld [vmem:[%s6862_s12 + $0x10] sm:$0xff] }
0x18b0   : > { %v5649_v21 = vpack.c.bf16 %v4454_v19, %v4453_v50 }
0x18b1   : > { %v4428_v59 = vsel %vm650_vm0, %v4427_v41, 0.0 }
0x18b2   : > { %4429 = vadd.xlane.f32.xlu0 %v4428_v59  ;;  %5650 = vmatpush3.bf16.msra.mxu0 %v5649_v21 }
0x193f   : > { %v4430_v13 = vpop.xlane.xlu0 %4429 }
0x1940   : > { %v4431_v14 = vmul.f32 0.03125, %v4430_v13 }
0x1942   : > { %v4432_v16 = vsub.f32 %v4427_v41, %v4431_v14 }
0x1944   : > { %v4433_v4 = vmul.f32 %v4432_v16, %v4432_v16 }
0x1946   : > { %v4434_v17 = vsel %vm650_vm0, %v4433_v4, 0.0 }
0x1947   : > { %4435 = vadd.xlane.f32.xlu1 %v4434_v17 }
0x19d4   : > { %v4436_v2 = vpop.xlane.xlu1 %4435 }
0x19d5   : > { %v4437_v63 = vmul.f32 0.03125, %v4436_v2 }
0x19d7   : > { %v4438_v52 = vadd.f32 1e-05, %v4437_v63 }
0x19d9   : > { %5753 = vrsqrt.f32 %v4438_v52 }
0x19e3   : > { %v5754_v36 = vpop.eup %5753 }
0x19e4   : > { %v4440_v37 = vmul.f32 %v5754_v36, %v4432_v16 }
0x19e6   : > { %v4445_v40 = vmul.f32 %v4444_v35, %v4440_v37 }
0x19e8   : > { %v4450_v32 = vadd.f32 %v4449_v39, %v4445_v40 }
0x19ea   : > { %5420 = vmatmul.mubr.msk.f32.vlgmr.msra.gmra.mrb[50].mxu0 %vm650_vm0, %v4450_v32 }
0x1abd   : > { %v4531_v61 = vpop.f32.mrb[50].mxu0 }
0x1abe   : > { %v4532_v15 = vadd.f32 %v4797_v60, %v4531_v61  ;;  %v5421_v62 = vpop.f32.mrb[51].mxu0 }
0x1ac0   : > { %v4537_v12 = vmul.f32 0.70710677, %v4532_v15  ;;  %v4535_v0 = vmul.f32 0.5, %v4532_v15 }
0x1ac2   : > { %5755 = verf.f32 %v4537_v12 }
0x1acc   : > { %v5756_v5 = vpop.eup %5755 }
0x1acd   : > { %v4539_v1 = vadd.f32 1.0, %v5756_v5 }
0x1acf   : > { %v4540_v3 = vmul.f32 %v4539_v1, %v4535_v0 }
0x1ad1   : > { %5455 = vmatmul.mubr.f32.vlgmr.msra.gmra.mrb[46].mxu1 %v4540_v3 }
0x1ba4   : > { %v4630_v58 = vpop.f32.mrb[46].mxu1 }
0x1ba5   : > { %v4631_v43 = vadd.f32 %v4799_v7, %v4630_v58  ;;  %v5456_v8 = vpop.f32.mrb[47].mxu1 }
0x1ba7   : > { %v4634_v26 = vadd.f32 %v4631_v43, %v4450_v32 }
0x1ba9   : > { %4635 = vst.msk [vmem:[%s527_s28] sm:$0xff] %vm650_vm0, %v4634_v26 }
0x1baa   : > { %5772 = shalt.err (!%p5769_p3)
}
0x1bab   : > { %s5773_s29 = scalar_lea.hbm %s6807_s18, 128  ;;  %s5777_s30 = scalar_lea.hbm %s6866_s16, 256 }
0x1bac   : > { %p5774_p4 = scmp.ne.s32.totalorder %s6807_s18, %s5773_s29  ;;  %p5778_p9 = scmp.lt.u32.totalorder %s6807_s18, %s6866_s16 }
0x1bad   : > { %p5779_p10 = scmp.lt.u32.totalorder %s5777_s30, %s5773_s29  ;;  %p5781_p12 = scmp.lt.u32.totalorder %s5773_s29, %s6807_s18 }
0x1bae   : > { %p5775_p7 = pnand %p5774_p4, %p5950_p5 }
0x1baf   : > { %p5780_p11 = por %p5779_p10, %p5778_p9 }
0x1bb0   : > { %p5776_p8 = pneg %p5775_p7 }
0x1bb1   : > { %p5782_p13 = por %p5781_p12, %p5780_p11 }
0x1bb3   : > { %p5783_p0 = pnand %p5782_p13, %p5776_p8 }
0x1bb5   : > { %5786 = shalt.err (!%p5783_p0)
}
0x1bb6   : > { %5675 = dma.vmem_to_hbm [thread:$0]  (%p5950_p5), %s6809_s23, 128, %s6807_s18, %s4637_s20  }
0x1bb7 PF: > { %p5681_p1 = scmp.ge.s32.totalorder %s5821_s24, 2  ;;  %s4662_s26 = sand.u32 1, %s5809_s21  }
0x1bb8   : > { %s4663_s19 = scalar_lea.sflag [#allocation3], %s4662_s26 }
0x1bb9   : > { %p5678_p2 = pnand %p5681_p1, %p5954_p6 }
0x1bbb   : > { %5804 = dma.done.wait (!%p5678_p2), %s4663_s19, 128  }
0x1bbc   : > { %5806 = vsyncadd (!%p5678_p2), %s4663_s19, 4294967168  ;;  %s6884_s24 = sld [smem:[#allocation6_spill]]  ;;  %s6885_s29 = sld [smem:[#allocation5_spill]] }
0x1bbd   : > { %s6886_s23 = sld [smem:[#allocation7_spill]]  ;;  %s6887_s21 = smov %s5813_s22 }
0x1bc2   : > { %p26_p3 = scmp.ge.s32.totalorder %s6884_s24, 4   ;;  %s6888_s22 = smov %s6885_s29 }
0x1bc4   :  { %28 = sbr.rel (!%p26_p3) target bundleno = 6 (0x6), region = 122 }
0x1bcb   :  { %4668 = vsyncpa [#allocation3], 1 }
0x1bcc   :  { %4670 = vsyncpa [#allocation3 + $0x1], 1 }

</bundles_post_ra>
